<compile_context>
chip_gen: v6e
topology: v6e:2x2x1
jax: 0.10.0
libtpu: 0.0.40
codegen_flags: <defaults>
</compile_context>

<pallas_src>
import numpy as np
import jax
import jax.numpy as jnp
from jax.experimental import pallas as pl
from jax.experimental.pallas import tpu as pltpu

OMEGA = 30.0           # SIREN sine frequency
NUM_HIDDEN_LAYERS = 3  # SingleBVPNet default num_hidden_layers
LANE = 128

HIGHEST = jax.lax.Precision.HIGHEST   # hyper kernel (HBM-bound, precision free)
SIREN_PREC = jax.lax.Precision.HIGH   # bf16_3x for the MXU-bound SIREN matmuls


def _matmul_nt(x, w, precision):
    # x:(M,K) , w:(N,K)  ->  x @ w.T : (M,N)   (torch.nn.Linear convention)
    return jax.lax.dot_general(
        x, w, dimension_numbers=(((1,), (1,)), ((), ())),
        precision=precision, preferred_element_type=jnp.float32)


def _matmul_nn(x, w, precision):
    # x:(M,K) , w:(K,N)  ->  x @ w : (M,N)
    return jax.lax.dot_general(
        x, w, dimension_numbers=(((1,), (0,)), ((), ())),
        precision=precision, preferred_element_type=jnp.float32)


def _derived_vmem_limit(block_bytes, scratch_bytes=0, headroom_bytes=12 << 20):
    # double-buffered pipeline blocks + live in-kernel activations + headroom
    return int(2 * block_bytes + scratch_bytes + headroom_bytes)


# ----------------------------------------------------------------------------
# Fused HyperNetwork: all 10 per-parameter FCBlocks in ONE kernel launch,
# tiled over TB-row blocks of the packed (param-padded) output dimension.
# A scalar-prefetched int32 array maps output-block index -> owning param, so
# each step recomputes that param's tiny (B,L)x(L,HH) first layer (resident
# DMA) and streams one (TB,HH) slab of second-layer weights.
# ----------------------------------------------------------------------------
def hyper_kernel(blk_param_ref, z_ref, w1_ref, b1_ref, w2_ref, b2_ref, out_ref):
    del blk_param_ref  # only used by the index_maps
    hidden = jnp.maximum(
        _matmul_nt(z_ref[...], w1_ref[0], HIGHEST) + b1_ref[0], 0.0)   # (B, HH)
    out_ref[...] = _matmul_nt(hidden, w2_ref[...], HIGHEST) + b2_ref[...]


def hyper_fused(z, w1_stack, b1_stack, w2_cat, b2_cat, blk_param, tb):
    # TODO(synk): w1_stack/w2_cat could be stored in bf16 (f32 accumulate
    # in-kernel) for ~2x on this HBM-bound launch, but that needs relaxing the
    # 1e-4 hypernet tolerance to ~1e-2, so it is not done here.
    B, L = z.shape
    P, HH, _ = w1_stack.shape
    total_pad = w2_cat.shape[0]
    num_blocks = total_pad // tb

    block_bytes = 4 * (B * L + HH * L + HH + tb * HH + tb + B * tb)
    vmem_limit = _derived_vmem_limit(block_bytes, scratch_bytes=4 * B * HH)

    grid_spec = pltpu.PrefetchScalarGridSpec(
        num_scalar_prefetch=1,
        grid=(num_blocks,),
        in_specs=[
            pl.BlockSpec((B, L), lambda j, bp: (0, 0)),          # z (resident)
            pl.BlockSpec((1, HH, L), lambda j, bp: (bp[j], 0, 0)),  # W1 of owning param
            pl.BlockSpec((1, 1, HH), lambda j, bp: (bp[j], 0, 0)),  # b1 of owning param
            pl.BlockSpec((tb, HH), lambda j, bp: (j, 0)),        # w2 block (streamed)
            pl.BlockSpec((1, tb), lambda j, bp: (0, j)),         # b2 block
        ],
        out_specs=pl.BlockSpec((B, tb), lambda j, bp: (0, j)),
    )
    return pl.pallas_call(
        hyper_kernel,
        out_shape=jax.ShapeDtypeStruct((B, total_pad), jnp.float32),
        grid_spec=grid_spec,
        compiler_params=pltpu.CompilerParams(
            dimension_semantics=("parallel",),
            vmem_limit_bytes=vmem_limit),
    )(blk_param, z, w1_stack, b1_stack, w2_cat, b2_cat)


# ----------------------------------------------------------------------------
# SIREN forward + analytic coords-gradient (in-tile reverse mode), tiled over
# points.  Weights are per-instance (generated by the hypernetwork) and stay
# resident across the inner N-tile grid axis.
# ----------------------------------------------------------------------------
def siren_fwd_grad_kernel(coords_ref, w0t_ref, b0_ref, whid_ref, bhid_ref,
                          wout_ref, bout_ref, out_ref):
    c = coords_ref[0]          # (TN, 3)
    w0t = w0t_ref[0]           # (3, H)   == W0.T
    b0 = b0_ref[0]             # (1, H)

    # First layer on the VPU: K=3 is far too small for the MXU -> 3 FMAs.
    pre = (c[:, 0:1] * w0t[0:1, :]
           + c[:, 1:2] * w0t[1:2, :]
           + c[:, 2:3] * w0t[2:3, :] + b0)                     # (TN, H)
    a = OMEGA * pre                                            # reused by sin & cos
    h = jnp.sin(a)
    d_stash = [OMEGA * jnp.cos(a)]                             # d_l = d h_l / d pre_l

    # Forward sweep through the hidden layers, stashing d_l for the reverse pass.
    for l in range(NUM_HIDDEN_LAYERS):
        wl = whid_ref[0, l]    # (H, H)  torch (out, in) layout
        bl = bhid_ref[0, l]    # (1, H)
        a = OMEGA * (_matmul_nt(h, wl, SIREN_PREC) + bl)
        h = jnp.sin(a)
        d_stash.append(OMEGA * jnp.cos(a))

    wout = wout_ref[0]                                         # (1, H)
    # sdf: lane (XLU) reduction, NOT an N=1 MXU matmul; bout added in-kernel.
    sdf = jnp.sum(h * wout, axis=-1)[None, :] + bout_ref[0]    # (1, TN)

    # Reverse sweep: one (TN,H)x(H,H) matmul per layer.
    u = wout * d_stash[NUM_HIDDEN_LAYERS]                      # cotangent on pre_L
    for l in range(NUM_HIDDEN_LAYERS - 1, -1, -1):
        u = _matmul_nn(u, whid_ref[0, l], SIREN_PREC) * d_stash[l]
    # Project onto the 3 coordinate directions (XLU lane reductions).
    gx = jnp.sum(u * w0t[0:1, :], axis=-1)[None, :]
    gy = jnp.sum(u * w0t[1:2, :], axis=-1)[None, :]
    gz = jnp.sum(u * w0t[2:3, :], axis=-1)[None, :]

    # Single lane-dense store: row 0 = sdf, rows 1..3 = d sdf / d (x, y, z).
    out_ref[0] = jnp.concatenate([sdf, gx, gy, gz], axis=0)    # (4, TN)


def siren_fwd_grad(coords, w0t, b0, whid, bhid, wout, bout, *, tn=256):
    B, N, _ = coords.shape
    H = w0t.shape[2]
    L3 = whid.shape[1]
    assert N % tn == 0, "N must be a multiple of the point-tile size"

    block_bytes = 4 * (tn * 3 + 3 * H + H + L3 * H * H + L3 * H + H + 1 + 4 * tn)
    scratch_bytes = 4 * (NUM_HIDDEN_LAYERS + 1 + 6) * tn * H   # d stash + h/a/u temps
    vmem_limit = _derived_vmem_limit(block_bytes, scratch_bytes)

    out = pl.pallas_call(
        siren_fwd_grad_kernel,
        out_shape=jax.ShapeDtypeStruct((B, 4, N), jnp.float32),
        grid=(B, N // tn),
        in_specs=[
            pl.BlockSpec((1, tn, 3), lambda b, n: (b, n, 0)),       # coords tile
            pl.BlockSpec((1, 3, H), lambda b, n: (b, 0, 0)),        # W0.T (resident)
            pl.BlockSpec((1, 1, H), lambda b, n: (b, 0, 0)),
            pl.BlockSpec((1, L3, H, H), lambda b, n: (b, 0, 0, 0)),
            pl.BlockSpec((1, L3, 1, H), lambda b, n: (b, 0, 0, 0)),
            pl.BlockSpec((1, 1, H), lambda b, n: (b, 0, 0)),
            pl.BlockSpec((1, 1, 1), lambda b, n: (b, 0, 0)),
        ],
        out_specs=pl.BlockSpec((1, 4, tn), lambda b, n: (b, 0, n)),
        compiler_params=pltpu.CompilerParams(
            dimension_semantics=("parallel", "parallel"),
            vmem_limit_bytes=vmem_limit),
    )(coords, w0t, b0, whid, bhid, wout, bout)
    sdf = jnp.transpose(out[:, 0:1, :], (0, 2, 1))       # (B, N, 1)
    grad = jnp.transpose(out[:, 1:4, :], (0, 2, 1))      # (B, N, 3)
    return sdf, grad


# ----------------------------------------------------------------------------
# Pure-JAX references (correctness checks), pinned to HIGHEST per-callsite.
# ----------------------------------------------------------------------------
def ref_hyper_mlp(z, w1, b1, w2, b2):
    h = jnp.maximum(jnp.matmul(z, w1.T, precision=HIGHEST) + b1, 0.0)
    return jnp.matmul(h, w2.T, precision=HIGHEST) + b2


def ref_siren(coords, w0, b0, whid, bhid, wout, bout):
    def single(c, w0_, b0_, wh_, bh_, wo_, bo_):
        h = jnp.sin(OMEGA * (jnp.matmul(c, w0_.T, precision=HIGHEST) + b0_))
        for l in range(NUM_HIDDEN_LAYERS):
            h = jnp.sin(OMEGA * (jnp.matmul(h, wh_[l].T, precision=HIGHEST) + bh_[l]))
        return jnp.matmul(h, wo_.T, precision=HIGHEST) + bo_
    sdf = jax.vmap(single)(coords, w0, b0, whid, bhid, wout, bout)
    grad = jax.grad(
        lambda c: jax.vmap(single)(c, w0, b0, whid, bhid, wout, bout).sum()
    )(coords)
    return sdf, grad


def _rel_err(a, b):
    return float(jnp.max(jnp.abs(a - b)) / (jnp.max(jnp.abs(b)) + 1e-8))


if __name__ == "__main__":
    NUM_INSTANCES = 4   # num_instances
    LATENT = 64         # latent_dim (scaled from 256)
    HYPER_H = 64        # hyper_hidden_features (scaled from 256)
    H = 64              # sdf_net hidden_features (scaled from 256)
    B = 2               # batch of instance indices
    N = 512             # points per instance
    TN = 256            # point tile (sweep 256-1024 at real scale; ~1 MiB footprint)
    TB_HYPER = 512      # packed-output row block for the hyper kernel
                        # (use 2048-4096 at the real 256-wide model size)

    keys = iter(jax.random.split(jax.random.PRNGKey(0), 64))

    # nn.Embedding(num_instances, latent_dim), init N(0, 0.01)
    latent_codes = 0.01 * jax.random.normal(next(keys), (NUM_INSTANCES, LATENT),
                                            jnp.float32)

    # Hypo-module parameter shapes (SingleBVPNet, sine FCBlock, H hidden, 3 hidden layers)
    hypo_shapes = [("w0", (H, 3)), ("b0", (H,)),
                   ("w1", (H, H)), ("b1", (H,)),
                   ("w2", (H, H)), ("b2", (H,)),
                   ("w3", (H, H)), ("b3", (H,)),
                   ("wout", (1, H)), ("bout", (1,))]

    # One hyper FCBlock (1 hidden layer + ReLU, outermost linear) per hypo parameter.
    hyper_params = {}
    for name, shape in hypo_shapes:
        dout = int(np.prod(shape))
        w1 = jax.random.normal(next(keys), (HYPER_H, LATENT), jnp.float32) / np.sqrt(LATENT)
        b1 = jnp.zeros((HYPER_H,), jnp.float32)
        w2 = 0.05 * jax.random.normal(next(keys), (dout, HYPER_H), jnp.float32) / np.sqrt(HYPER_H)
        b2 = 0.05 * jax.random.normal(next(keys), (dout,), jnp.float32)
        hyper_params[name] = (w1, b1, w2, b2)

    # Packed output layout: each hypo-parameter slab padded to a multiple of
    # TB_HYPER rows so the output grid blocks never span two params and every
    # store / host-side slice is lane-aligned.
    meta = []
    off = 0
    for name, shape in hypo_shapes:
        dout = int(np.prod(shape))
        dpad = ((dout + TB_HYPER - 1) // TB_HYPER) * TB_HYPER
        meta.append((name, shape, dout, off, dpad))
        off += dpad
    TOTAL_PAD = off
    NUM_BLOCKS = TOTAL_PAD // TB_HYPER

    # Block -> owning-param map (scalar-prefetched into SMEM).
    blk_param_np = np.zeros((NUM_BLOCKS,), np.int32)
    for p, (name, shape, dout, off_p, dpad) in enumerate(meta):
        blk_param_np[off_p // TB_HYPER:(off_p + dpad) // TB_HYPER] = p
    blk_param = jnp.asarray(blk_param_np)

    # Stacked / concatenated hypernetwork weights for the single fused launch.
    w1_stack = jnp.stack([hyper_params[name][0] for name, _ in hypo_shapes], axis=0)      # (P,HH,L)
    b1_stack = jnp.stack([hyper_params[name][1][None, :] for name, _ in hypo_shapes], 0)  # (P,1,HH)
    w2_cat_np = np.zeros((TOTAL_PAD, HYPER_H), np.float32)
    b2_cat_np = np.zeros((1, TOTAL_PAD), np.float32)
    for name, shape, dout, off_p, dpad in meta:
        w2_cat_np[off_p:off_p + dout, :] = np.asarray(hyper_params[name][2])
        b2_cat_np[0, off_p:off_p + dout] = np.asarray(hyper_params[name][3])
    w2_cat = jnp.asarray(w2_cat_np)
    b2_cat = jnp.asarray(b2_cat_np)

    # model_input
    instance_idx = jnp.array([1, 3], dtype=jnp.int32)                     # (B,)
    coords = jax.random.uniform(next(keys), (B, N, 3), jnp.float32, -1.0, 1.0)

    # --- forward ---
    # embedding lookup (XLA glue)
    embedding = jnp.take(latent_codes, instance_idx, axis=0)              # (B, LATENT)

    # hyper_net(embedding): ONE Pallas launch, tiled over the packed output dim.
    packed = hyper_fused(embedding, w1_stack, b1_stack, w2_cat, b2_cat,
                         blk_param, TB_HYPER)
    hypo = {name: packed[:, off_p:off_p + dout]
            for (name, shape, dout, off_p, dpad) in meta}

    # TODO(synk): reshape/stack staging of the generated params below is still XLA
    # glue; full hypernet->SIREN fusion (params never round-tripping HBM) is not done.
    w0 = hypo["w0"].reshape(B, H, 3)
    w0t = jnp.transpose(w0, (0, 2, 1))                                     # (B, 3, H)
    b0 = hypo["b0"].reshape(B, 1, H)
    whid = jnp.stack([hypo[f"w{l}"].reshape(B, H, H) for l in (1, 2, 3)], axis=1)  # (B,3,H,H)
    bhid = jnp.stack([hypo[f"b{l}"].reshape(B, 1, H) for l in (1, 2, 3)], axis=1)  # (B,3,1,H)
    wout = hypo["wout"].reshape(B, 1, H)
    bout = hypo["bout"].reshape(B, 1, 1)

    # sdf_net forward + grad_sdf (fused Pallas kernel, tiled over points)
    sdf, grad_sdf = siren_fwd_grad(coords, w0t, b0, whid, bhid, wout, bout, tn=TN)
    jax.block_until_ready((sdf, grad_sdf))

    model_out = {"model_in": coords, "model_out": sdf,
                 "latent_vec": embedding, "grad_sdf": grad_sdf}
    # TODO(synk): implicit_loss(...) is not defined in the provided source; forward
    # stops at model_out (model_in, model_out, latent_vec, grad_sdf).

    # --- sanity checks against pure-JAX references ---
    for name, _ in hypo_shapes:
        ref = ref_hyper_mlp(embedding, *hyper_params[name])
        assert _rel_err(hypo[name], ref) < 1e-4, f"hyper mismatch on {name}"
    # SIREN matmuls run at Precision.HIGH (bf16_3x); estimated error after the
    # OMEGA=30 amplification stays ~1e-3 relative, so the 5e-3 tolerance holds.
    ref_sdf, ref_grad = ref_siren(coords, w0, b0, whid, bhid, wout, bout)
    assert _rel_err(sdf, ref_sdf) < 5e-3, "sdf mismatch"
    assert _rel_err(grad_sdf, ref_grad) < 5e-3, "grad_sdf mismatch"

    print("KERNEL_OK")
</pallas_src>

<mosaic_0001>
module attributes {stable_mosaic.version = 11 : i64} {
  func.func @hyper_kernel(%arg0: i32, %arg1: memref<31xi32, #tpu.memory_space<smem>>, %arg2: memref<2x64xf32, #tpu.memory_space<vmem>>, %arg3: memref<1x64x64xf32, #tpu.memory_space<vmem>>, %arg4: memref<1x1x64xf32, #tpu.memory_space<vmem>>, %arg5: memref<512x64xf32, #tpu.memory_space<vmem>>, %arg6: memref<1x512xf32, #tpu.memory_space<vmem>>, %arg7: memref<2x512xf32, #tpu.memory_space<vmem>>) attributes {dimension_semantics = [#tpu.dimension_semantics<parallel>], iteration_bounds = array<i64: 31>, scalar_prefetch = 1 : i64, scratch_operands = 0 : i64, tpu.core_type = #tpu.core_type<tc>, window_params = [{pipeline_mode = #tpu.pipeline_mode<synchronous>, transform_indices = @transform_0, window_bounds = array<i64: 2, 64>}, {transform_indices = @transform_1, window_bounds = array<i64: 1, 64, 64>}, {transform_indices = @transform_2, window_bounds = array<i64: 1, 1, 64>}, {transform_indices = @transform_3, window_bounds = array<i64: 512, 64>}, {transform_indices = @transform_4, window_bounds = array<i64: 1, 512>}, {transform_indices = @transform_5, window_bounds = array<i64: 2, 512>}]} {
    %c0 = arith.constant 0 : index
    %c0_0 = arith.constant 0 : index
    %0 = vector.load %arg2[%c0, %c0_0] : memref<2x64xf32, #tpu.memory_space<vmem>>, vector<2x64xf32>
    %c0_1 = arith.constant 0 : index
    %c0_2 = arith.constant 0 : index
    %c0_3 = arith.constant 0 : index
    %1 = vector.load %arg3[%c0_1, %c0_2, %c0_3] : memref<1x64x64xf32, #tpu.memory_space<vmem>>, vector<1x64x64xf32>
    %2 = vector.shape_cast %1 : vector<1x64x64xf32> to vector<64x64xf32>
    %cst = arith.constant dense<0.000000e+00> : vector<2x64xf32>
    %3 = tpu.matmul %0, %2, %cst {dimension_numbers = #tpu.dot_dimension_numbers<[1], [1], [0], [0], [0, 0, 1, 0], [], []>, precision = #tpu.contract_precision<fp32>} : vector<2x64xf32>, vector<64x64xf32>, vector<2x64xf32> -> vector<2x64xf32>
    %c0_4 = arith.constant 0 : index
    %c0_5 = arith.constant 0 : index
    %c0_6 = arith.constant 0 : index
    %4 = vector.load %arg4[%c0_4, %c0_5, %c0_6] : memref<1x1x64xf32, #tpu.memory_space<vmem>>, vector<1x1x64xf32>
    %5 = vector.shape_cast %4 : vector<1x1x64xf32> to vector<1x64xf32>
    %6 = vector.broadcast %5 : vector<1x64xf32> to vector<2x64xf32>
    %7 = arith.addf %3, %6 : vector<2x64xf32>
    %cst_7 = arith.constant 0.000000e+00 : f32
    %8 = vector.broadcast %cst_7 : f32 to vector<2x64xf32>
    %9 = arith.maximumf %7, %8 : vector<2x64xf32>
    %c0_8 = arith.constant 0 : index
    %c0_9 = arith.constant 0 : index
    %10 = vector.load %arg5[%c0_8, %c0_9] : memref<512x64xf32, #tpu.memory_space<vmem>>, vector<512x64xf32>
    %cst_10 = arith.constant dense<0.000000e+00> : vector<2x512xf32>
    %11 = tpu.matmul %9, %10, %cst_10 {dimension_numbers = #tpu.dot_dimension_numbers<[1], [1], [0], [0], [0, 0, 1, 0], [], []>, precision = #tpu.contract_precision<fp32>} : vector<2x64xf32>, vector<512x64xf32>, vector<2x512xf32> -> vector<2x512xf32>
    %c0_11 = arith.constant 0 : index
    %c0_12 = arith.constant 0 : index
    %12 = vector.load %arg6[%c0_11, %c0_12] : memref<1x512xf32, #tpu.memory_space<vmem>>, vector<1x512xf32>
    %13 = vector.broadcast %12 : vector<1x512xf32> to vector<2x512xf32>
    %14 = arith.addf %11, %13 : vector<2x512xf32>
    %c0_13 = arith.constant 0 : index
    %c0_14 = arith.constant 0 : index
    %15 = vector.load %arg7[%c0_13, %c0_14] : memref<2x512xf32, #tpu.memory_space<vmem>>, vector<2x512xf32>
    tpu.vector_store %arg7[%c0_13, %c0_14], %14 {strides = array<i32>} : memref<2x512xf32, #tpu.memory_space<vmem>>, vector<2x512xf32>,
    return
  }
  func.func @transform_0(%arg0: i32, %arg1: memref<31xi32, #tpu.memory_space<smem>>) -> (i32, i32) {
    %c0_i32 = arith.constant 0 : i32
    %c0_i32_0 = arith.constant 0 : i32
    %c0_i32_1 = arith.constant 0 : i32
    return %c0_i32, %c0_i32_0 : i32, i32
  }
  func.func @transform_1(%arg0: i32, %arg1: memref<31xi32, #tpu.memory_space<smem>>) -> (i32, i32, i32) {
    %0 = arith.index_cast %arg0 : i32 to index
    %1 = memref.load %arg1[%0] : memref<31xi32, #tpu.memory_space<smem>>
    %c0_i32 = arith.constant 0 : i32
    %c0_i32_0 = arith.constant 0 : i32
    %c0_i32_1 = arith.constant 0 : i32
    return %1, %c0_i32, %c0_i32_0 : i32, i32, i32
  }
  func.func @transform_2(%arg0: i32, %arg1: memref<31xi32, #tpu.memory_space<smem>>) -> (i32, i32, i32) {
    %0 = arith.index_cast %arg0 : i32 to index
    %1 = memref.load %arg1[%0] : memref<31xi32, #tpu.memory_space<smem>>
    %c0_i32 = arith.constant 0 : i32
    %c0_i32_0 = arith.constant 0 : i32
    %c0_i32_1 = arith.constant 0 : i32
    return %1, %c0_i32, %c0_i32_0 : i32, i32, i32
  }
  func.func @transform_3(%arg0: i32, %arg1: memref<31xi32, #tpu.memory_space<smem>>) -> (i32, i32) {
    %c0_i32 = arith.constant 0 : i32
    %c0_i32_0 = arith.constant 0 : i32
    return %arg0, %c0_i32 : i32, i32
  }
  func.func @transform_4(%arg0: i32, %arg1: memref<31xi32, #tpu.memory_space<smem>>) -> (i32, i32) {
    %c0_i32 = arith.constant 0 : i32
    %c0_i32_0 = arith.constant 0 : i32
    return %c0_i32, %arg0 : i32, i32
  }
  func.func @transform_5(%arg0: i32, %arg1: memref<31xi32, #tpu.memory_space<smem>>) -> (i32, i32) {
    %c0_i32 = arith.constant 0 : i32
    %c0_i32_0 = arith.constant 0 : i32
    return %c0_i32, %arg0 : i32, i32
  }
}

</mosaic_0001>

<bundles_post_ra>
// kernel: tpu_custom_call.1
= control target key start
LH: loop header
LB: loop body
LE: loop exit
PB: predicated region body
PF: predicated region fallthrough
CT: control target
= control target key end

     0   :  { %s5198_s0 = inlined_call_operand.vmem [shape: s32[31], index: 0, kind: input, shape index: {}]   ;;  %s5199_s1 = inlined_call_operand.vmem [shape: f32[2,64], index: 1, kind: input, shape index: {}]   ;;  %s5200_s2 = inlined_call_operand.vmem [shape: f32[10,64,64], index: 2, kind: input, shape index: {}]   ;;  %s5201_s3 = inlined_call_operand.vmem [shape: f32[10,1,64], index: 3, kind: input, shape index: {}]   ;;  %s5202_s4 = inlined_call_operand.vmem [shape: f32[15872,64], index: 4, kind: input, shape index: {}]   ;;  %s5203_s5 = inlined_call_operand.vmem [shape: f32[1,15872], index: 5, kind: input, shape index: {}]   ;;  %s5204_s6 = inlined_call_operand.hbm [shape: f32[2,15872], index: 6, kind: output, shape index: {}]  }
   0x1   :  { %s11_s23 = sshll.u32 %s5198_s0, 4  ;;  %s12_s23 = int_to_ptr.vmem [resolvable:$true] %s11_s23 }
   0x2   :  { %s3637_s24 = scalar_lea.vmem %s12_s23, 16  ;;  %p3642_p1 = scmp.lt.s32.totalorder %s12_s23, %s12_s23 }
   0x3   :  { %p3638_p0 = scmp.ne.s32.totalorder %s12_s23, %s3637_s24  ;;  %p3643_p2 = scmp.lt.s32.totalorder %s3637_s24, %s3637_s24 }
   0x5   :  { %p3644_p3 = por %p3643_p2, %p3642_p1 }
   0x7   :  { %p3645_p4 = pnand %p3644_p3, %p3638_p0 }
   0x9   :  { %3648 = shalt.err (!%p3645_p4)  }
   0xa   :  { %s3713_s25 = smov [#allocation3]  }
   0xb   :  { %14 = dma.vmem_to_smem %s12_s23, 16, %s3713_s25, [#allocation2] }
   0xc   :  { %3691 = dma.done.wait [#allocation2], 16 }
   0xd   :  { %3692 = vsyncadd [#allocation2], 4294967280 }
   0xe   :  { %16 = sfence }
   0xf   :  { %17 = vsyncpa [#allocation5], 0 }
  0x10   :  { %19 = vsyncpa [#allocation5 + $0x1], 0  ;;  %s3756_s26 = smov 0   ;;  %s3758_s27 = smov 0  }
  0x11   :  { %s3760_s0 = smov 0   ;;  %s3762_s28 = smov 0  }
  0x12 LB: > { %s3777_s29 = sadd.s32 4294967295, %s3711_s28   ;;  %s3000_s30 = sadd.s32 4294967294, %s3711_s28   ;;  %s3711_s28 = sphi %s3762_s28, %s5498_s28   ;;  %s3707_s0 = sphi %s3760_s0, %s5497_s0   ;;  %s3703_s27 = sphi %s3758_s27, %s5496_s27   ;;  %s3699_s26 = sphi %s3756_s26, %s5495_s26  }
  0x13   : > { %s3781_s7 = sadd.s32 1, %s3711_s28   ;;  %s161_s8 = sadd.s32 1, %s3707_s0 }
  0x14   : > { %s158_s9 = ssub.s32 %s3711_s28, %s3781_s7  ;;  %p171_p5 = scmp.ne.s32.totalorder %s3707_s0, %s3703_s27 }
  0x15   : > { %p159_p6 = scmp.eq.s32.totalorder %s158_s9, 0  ;;  %p172_p7 = scmp.eq.s32.totalorder %s3777_s29, 30 }
  0x16   : > { %p177_p8 = scmp.ne.s32.totalorder %s3703_s27, %s3699_s26  ;;  %p178_p9 = scmp.eq.s32.totalorder %s3000_s30, 30 }
  0x17   : > { %s3792_s10 = scalar_select %p159_p6, %s3707_s0, %s161_s8  }
  0x18   : > { %p3794_p10 = por %p172_p7, %p171_p5  ;;  %p3798_p11 = por %p178_p9, %p177_p8 }
  0x19   : > { %p3003_p12 = scmp.ge.s32.totalorder %s3711_s28, 1  ;;  %p234_p13 = scmp.lt.s32.totalorder %s3711_s28, 32 }
  0x1b   : > { %p235_p0 = pnand %p3003_p12, %p234_p13 }
  0x1d   : > { %238 = sbr.rel (%p235_p0) target bundleno = 899 (0x383), region = 40 }
  0x22   : > { %s276_s13 = sld [smem:[#allocation3 + %s3777_s29]]  ;;  %v3714_v0 = vmov 0.0   ;;  %vm3715_vm0 = vmmov 0   ;;  %vm316_vm1 = vcmask 523264   ;;  %v300_v28 = vld [vmem:[%s5199_s1] sm:$0x3] }
  0x23   : > { %3480 = vmatprep.subr.mxu0 %v3714_v0  ;;  %3499 = vmatprep.subr.mxu1 %v3714_v0  ;;  %v318_v32 = vsel %vm316_vm1, %v300_v28, 0  ;;  %s3007_s20 = sshll.u32 %s3777_s29, 6  ;;  %s283_s25 = sld [smem:[#allocation3 + %s3777_s29]] }
  0x24   : > { %3496 = vmatprep.mubr.msk.f32.mxu0 %vm3715_vm0, %v3714_v0  ;;  %3515 = vmatprep.mubr.msk.f32.mxu1 %vm3715_vm0, %v3714_v0  ;;  %v3885_v40 = vand.u32 4294901760, %v318_v32  ;;  %p289_p2 = scmp.lt.s32.totalorder %s3007_s20, 1983  ;;  %s3017_s19 = sshll.u32 %s3777_s29, 7 }
  0x25   : > { %s3717_s8 = smov [#allocation4]  }
  0x26   : > { %v3900_v46 = vsub.f32 %v318_v32, %v3885_v40  ;;  %s5502_s20 = smov (!%p289_p2, %s3007_s20), 1983 }
  0x27   : > { %s3008_s21 = sshll.u32 %s5502_s20, 3 }
  0x28   : > { %p277_p1 = scmp.lt.s32.totalorder %s276_s13, 9  ;;  %v419_v51 = vand.u32 4294901760, %v3900_v46  ;;  %s4027_s24 = scalar_lea.vmem %s5202_s4, %s3008_s21 }
  0x29   : > { %p284_p3 = scmp.lt.s32.totalorder %s283_s25, 9 }
  0x2a   : > { %s5500_s13 = smov (!%p277_p1, %s276_s13), 9  ;;  %v420_v56 = vsub.f32 %v3900_v46, %v419_v51 }
  0x2b   : > { %s3016_s14 = sshll.u32 %s5500_s13, 6  ;;  %s5504_s25 = smov (!%p284_p3, %s283_s25), 9 }
  0x2c   : > { %s3814_s17 = scalar_lea.vmem %s5200_s2, %s3016_s14  ;;  %v421_v60 = vand.u32 4294901760, %v420_v56  ;;  %v893_v56 = vld [vmem:[%s4027_s24 + $0x58] sm:$0xff]  ;;  %s286_s9 = scalar_lea.vmem %s5201_s3, %s5504_s25 }
  0x2d   : > { %v308_v1 = vld [vmem:[%s3814_s17 + $0x38] sm:$0xff]  ;;  %v307_v2 = vld [vmem:[%s3814_s17 + $0x30] sm:$0xff]  ;;  %v306_v3 = vld [vmem:[%s3814_s17 + $0x28] sm:$0xff]  ;;  %s3009_s13 = sshll.u32 %s3777_s29, 2 }
  0x2e   : > { %v342_v4 = vsel %vm316_vm1, %v308_v1, 0  ;;  %v339_v5 = vsel %vm316_vm1, %v307_v2, 0  ;;  %v336_v6 = vsel %vm316_vm1, %v306_v3, 0  ;;  %v305_v7 = vld [vmem:[%s3814_s17 + $0x20] sm:$0xff]  ;;  %v304_v8 = vld [vmem:[%s3814_s17 + $0x18] sm:$0xff]  ;;  %v303_v18 = vld [vmem:[%s3814_s17 + $0x10] sm:$0xff] }
  0x2f   : > { %v3824_v9 = vand.u32 4294901760, %v342_v4  ;;  %v3826_v10 = vand.u32 4294901760, %v339_v5  ;;  %v3828_v11 = vand.u32 4294901760, %v336_v6  ;;  %v333_v12 = vsel %vm316_vm1, %v305_v7, 0  ;;  %v302_v27 = vld [vmem:[%s3814_s17 + $0x8] sm:$0xff]  ;;  %v301_v37 = vld [vmem:[%s3814_s17] sm:$0xff] }
  0x30   : > { %v3831_v13 = vand.u32 4294901760, %v333_v12  ;;  %v330_v16 = vsel %vm316_vm1, %v304_v8, 0  ;;  %v327_v22 = vsel %vm316_vm1, %v303_v18, 0  ;;  %v324_v31 = vsel %vm316_vm1, %v302_v27, 0  ;;  %v913_v1 = vld [vmem:[%s4027_s24 + $0xf8] sm:$0xff]  ;;  %v912_v7 = vld [vmem:[%s4027_s24 + $0xf0] sm:$0xff] }
  0x31   : > { %3481 = vmatpush3.xpose.msra.mxu0 %v3824_v9  ;;  %v3835_v14 = vsub.f32 %v342_v4, %v3824_v9  ;;  %v3838_v15 = vsub.f32 %v339_v5, %v3826_v10  ;;  %v3842_v17 = vsub.f32 %v336_v6, %v3828_v11  ;;  %v3848_v21 = vand.u32 4294901760, %v330_v16  ;;  %v897_v3 = vld [vmem:[%s4027_s24 + $0x78] sm:$0xff]  ;;  %p295_p4 = scmp.lt.s32.totalorder %s3009_s13, 123  ;;  %s273_s17 = sand.u32 1, %s3703_s27  }
  0x32   : > { %3482 = vmatprep.subr.mxu0 %v3714_v0  ;;  %v3860_v26 = vsub.f32 %v333_v12, %v3831_v13  ;;  %v3867_v30 = vand.u32 4294901760, %v327_v22  ;;  %v3882_v38 = vand.u32 4294901760, %v324_v31  ;;  %v321_v39 = vsel %vm316_vm1, %v301_v37, 0  ;;  %s3004_s18 = sshll.u32 %s273_s17, 3  ;;  %s2897_s25 = scalar_lea.sflag [#allocation5], %s273_s17 }
  0x33   : > { %v446_v19 = vand.u32 4294901760, %v3835_v14  ;;  %v453_v20 = vand.u32 4294901760, %v3838_v15  ;;  %v460_v25 = vand.u32 4294901760, %v3842_v17  ;;  %v3877_v36 = vsub.f32 %v330_v16, %v3848_v21  ;;  %v910_v16 = vld [vmem:[%s4027_s24 + $0xe0] sm:$0xff]  ;;  %s5506_s13 = smov (!%p295_p4, %s3009_s13), 123  ;;  %s275_s20 = scalar_lea.vmem [#allocation4], %s3004_s18 }
  0x34   : > { %v467_v35 = vand.u32 4294901760, %v3860_v26  ;;  %v3893_v44 = vsub.f32 %v327_v22, %v3867_v30  ;;  %v3897_v45 = vand.u32 4294901760, %v321_v39  ;;  %v3908_v50 = vsub.f32 %v324_v31, %v3882_v38  ;;  %s297_s16 = scalar_lea.vmem %s5203_s5, %s5506_s13  ;;  %s2911_s21 = sshll.u32 %s275_s20, 4  ;;  %s2912_s21 = int_to_ptr.vmem [resolvable:$true] %s2911_s21 }
  0x35   : > { %3483 = vmatpush3.xpose.msra.mxu0 %v3826_v10  ;;  %v447_v23 = vsub.f32 %v3835_v14, %v446_v19  ;;  %v454_v24 = vsub.f32 %v3838_v15, %v453_v20  ;;  %v461_v34 = vsub.f32 %v3842_v17, %v460_v25  ;;  %v474_v43 = vand.u32 4294901760, %v3877_v36  ;;  %s3649_s30 = scalar_lea.vmem %s2912_s21, 128 }
  0x36   : > { %3484 = vmatprep.subr.mxu0 %v3714_v0  ;;  %v468_v42 = vsub.f32 %v3860_v26, %v467_v35  ;;  %v481_v49 = vand.u32 4294901760, %v3893_v44  ;;  %v488_v54 = vand.u32 4294901760, %v3908_v50  ;;  %v3919_v55 = vsub.f32 %v321_v39, %v3897_v45  ;;  %p3650_p5 = scmp.ne.s32.totalorder %s2912_s21, %s3649_s30 }
  0x37   : > { %v448_v29 = vand.u32 4294901760, %v447_v23  ;;  %v455_v33 = vand.u32 4294901760, %v454_v24  ;;  %v462_v41 = vand.u32 4294901760, %v461_v34  ;;  %v475_v48 = vsub.f32 %v3877_v36, %v474_v43 }
  0x38   : > { %v469_v47 = vand.u32 4294901760, %v468_v42  ;;  %v482_v53 = vsub.f32 %v3893_v44, %v481_v49  ;;  %v489_v58 = vsub.f32 %v3908_v50, %v488_v54  ;;  %v495_v59 = vand.u32 4294901760, %v3919_v55  ;;  %p3651_p6 = pnand %p3650_p5, %p3794_p10 }
  0x39   : > { %3485 = vmatpush3.xpose.msra.mxu0 %v3828_v11  ;;  %3500 = vmatpush3.xpose.msra.mxu1 %v448_v29  ;;  %v476_v52 = vand.u32 4294901760, %v475_v48  ;;  %v1065_v2 = vsel %vm316_vm1, %v913_v1, 0  ;;  %v1056_v28 = vsel %vm316_vm1, %v910_v16, 0  ;;  %v907_v16 = vld [vmem:[%s4027_s24 + $0xc8] sm:$0xff] }
  0x3a   : > { %3486 = vmatprep.subr.mxu0 %v3714_v0  ;;  %3501 = vmatprep.subr.mxu1 %v3714_v0  ;;  %v483_v57 = vand.u32 4294901760, %v482_v53  ;;  %v490_v61 = vand.u32 4294901760, %v489_v58  ;;  %v496_v62 = vsub.f32 %v3919_v55, %v495_v59  ;;  %v4033_v4 = vand.u32 4294901760, %v1065_v2  ;;  %p3652_p7 = pneg %p3651_p6 }
  0x3b   : > { %v1005_v58 = vsel %vm316_vm1, %v893_v56, 0 }
  0x3c   : > { %v497_v63 = vand.u32 4294901760, %v496_v62  ;;  %5338 = vst [vmem:[#allocation8_spill] sm:$0xff] %v4033_v4  ;;  %v4040_v6 = vsub.f32 %v1065_v2, %v4033_v4  ;;  %v908_v62 = vld [vmem:[%s4027_s24 + $0xd0] sm:$0xff] }
  0x3d   : > { %3487 = vmatpush3.xpose.msra.mxu0 %v3831_v13  ;;  %3502 = vmatpush3.xpose.msra.mxu1 %v455_v33  ;;  %v1050_v2 = vsel %vm316_vm1, %v908_v62, 0 }
  0x3e   : > { %3488 = vmatprep.subr.mxu0 %v3714_v0  ;;  %3503 = vmatprep.subr.mxu1 %v3714_v0  ;;  %5339 = vst [vmem:[#allocation9_spill] sm:$0xff] %v4040_v6 }
  0x41   : > { %3489 = vmatpush3.xpose.msra.mxu0 %v3848_v21  ;;  %3504 = vmatpush3.xpose.msra.mxu1 %v462_v41 }
  0x42   : > { %3490 = vmatprep.subr.mxu0 %v3714_v0  ;;  %3505 = vmatprep.subr.mxu1 %v3714_v0 }
  0x45   : > { %3491 = vmatpush3.xpose.msra.mxu0 %v3867_v30  ;;  %3506 = vmatpush3.xpose.msra.mxu1 %v469_v47 }
  0x46   : > { %3492 = vmatprep.subr.mxu0 %v3714_v0  ;;  %3507 = vmatprep.subr.mxu1 %v3714_v0 }
  0x49   : > { %3493 = vmatpush3.xpose.msra.mxu0 %v3882_v38  ;;  %3508 = vmatpush3.xpose.msra.mxu1 %v476_v52 }
  0x4a   : > { %3494 = vmatprep.subr.mxu0 %v3714_v0  ;;  %3509 = vmatprep.subr.mxu1 %v3714_v0 }
  0x4d   : > { %3495 = vmatpush3.xpose.msra.mxu0 %v3897_v45  ;;  %3510 = vmatpush3.xpose.msra.mxu1 %v483_v57 }
  0x4e   : > { %3511 = vmatprep.subr.mxu1 %v3714_v0  ;;  %3518 = vmatprep.subr.mxu0 %v3714_v0 }
  0x50   : > { %3497 = vmatmul.mubr.f32.vlgmr.msra.gmra.mxu0 %v421_v60  ;;  %v4133_v60 = vand.u32 4294901760, %v1005_v58 }
  0x51   : > { %3512 = vmatpush3.xpose.msra.mxu1 %v490_v61  ;;  %3519 = vmatpush3.xpose.msra.mxu0 %v3835_v14  ;;  %v911_v14 = vld [vmem:[%s4027_s24 + $0xe8] sm:$0xff] }
  0x52   : > { %3513 = vmatprep.subr.mxu1 %v3714_v0  ;;  %3520 = vmatprep.subr.mxu0 %v3714_v0  ;;  %v4141_v1 = vsub.f32 %v1005_v58, %v4133_v60 }
  0x53   : > { %3534 = vmatprep.mubr.msk.f32.mxu0 %vm3715_vm0, %v3714_v0 }
  0x55   : > { %3514 = vmatpush3.xpose.msra.mxu1 %v497_v63  ;;  %3521 = vmatpush3.xpose.msra.mxu0 %v3838_v15  ;;  %v895_v15 = vld [vmem:[%s4027_s24 + $0x68] sm:$0xff] }
  0x56   : > { %3522 = vmatprep.subr.mxu0 %v3714_v0  ;;  %3537 = vmatprep.subr.mxu1 %v3714_v0 }
  0x58   : > { %3516 = vmatmul.mubr.f32.vlgmr.msra.gmra.mxu1 %v3885_v40 }
  0x59   : > { %3523 = vmatpush3.xpose.msra.mxu0 %v3842_v17  ;;  %3538 = vmatpush3.xpose.msra.mxu1 %v3824_v9 }
  0x5a   : > { %3524 = vmatprep.subr.mxu0 %v3714_v0  ;;  %3539 = vmatprep.subr.mxu1 %v3714_v0 }
  0x5b   : > { %3553 = vmatprep.mubr.msk.f32.mxu1 %vm3715_vm0, %v3714_v0 }
  0x5d   : > { %3525 = vmatpush3.xpose.msra.mxu0 %v3860_v26  ;;  %3540 = vmatpush3.xpose.msra.mxu1 %v3826_v10 }
  0x5e   : > { %3526 = vmatprep.subr.mxu0 %v3714_v0  ;;  %3541 = vmatprep.subr.mxu1 %v3714_v0 }
  0x61   : > { %3527 = vmatpush3.xpose.msra.mxu0 %v3877_v36  ;;  %3542 = vmatpush3.xpose.msra.mxu1 %v3828_v11  ;;  %v4092_v36 = vand.u32 4294901760, %v1056_v28 }
  0x62   : > { %3528 = vmatprep.subr.mxu0 %v3714_v0  ;;  %3543 = vmatprep.subr.mxu1 %v3714_v0 }
  0x63   : > { %v4105_v42 = vsub.f32 %v1056_v28, %v4092_v36 }
  0x65   : > { %3529 = vmatpush3.xpose.msra.mxu0 %v3893_v44  ;;  %3544 = vmatpush3.xpose.msra.mxu1 %v3831_v13  ;;  %v5216_v48 = vand.u32 4294901760, %v4105_v42 }
  0x66   : > { %3530 = vmatprep.subr.mxu0 %v3714_v0  ;;  %3545 = vmatprep.subr.mxu1 %v3714_v0 }
  0x67   : > { %v1408_v53 = vsub.f32 %v4105_v42, %v5216_v48 }
  0x69   : > { %3531 = vmatpush3.xpose.msra.mxu0 %v3908_v50  ;;  %3546 = vmatpush3.xpose.msra.mxu1 %v3848_v21 }
  0x6a   : > { %3532 = vmatprep.subr.mxu0 %v3714_v0  ;;  %3547 = vmatprep.subr.mxu1 %v3714_v0 }
  0x6d   : > { %3533 = vmatpush3.xpose.msra.mxu0 %v3919_v55  ;;  %3548 = vmatpush3.xpose.msra.mxu1 %v3867_v30 }
  0x6e   : > { %3549 = vmatprep.subr.mxu1 %v3714_v0  ;;  %3556 = vmatprep.subr.mxu0 %v3714_v0 }
  0x70   : > { %3535 = vmatmul.mubr.f32.vlgmr.msra.gmra.mxu0 %v3900_v46 }
  0x71   : > { %3550 = vmatpush3.xpose.msra.mxu1 %v3882_v38  ;;  %3557 = vmatpush3.xpose.msra.mxu0 %v446_v19  ;;  %v1059_v19 = vsel %vm316_vm1, %v911_v14, 0 }
  0x72   : > { %3551 = vmatprep.subr.mxu1 %v3714_v0  ;;  %3558 = vmatprep.subr.mxu0 %v3714_v0  ;;  %v4069_v24 = vand.u32 4294901760, %v1059_v19 }
  0x73   : > { %3572 = vmatprep.mubr.msk.f32.mxu0 %vm3715_vm0, %v3714_v0 }
  0x74   : > { %v4085_v32 = vsub.f32 %v1059_v19, %v4069_v24 }
  0x75   : > { %3552 = vmatpush3.xpose.msra.mxu1 %v3897_v45  ;;  %3559 = vmatpush3.xpose.msra.mxu0 %v453_v20  ;;  %v1011_v20 = vsel %vm316_vm1, %v895_v15, 0 }
  0x76   : > { %3560 = vmatprep.subr.mxu0 %v3714_v0  ;;  %3575 = vmatprep.subr.mxu1 %v3714_v0  ;;  %v5221_v39 = vand.u32 4294901760, %v4085_v32 }
  0x78   : > { %3554 = vmatmul.mubr.f32.vlgmr.msra.gmra.mxu1 %v419_v51  ;;  %v909_v51 = vld [vmem:[%s4027_s24 + $0xd8] sm:$0xff] }
  0x79   : > { %3561 = vmatpush3.xpose.msra.mxu0 %v460_v25  ;;  %3576 = vmatpush3.xpose.msra.mxu1 %v3824_v9  ;;  %v1062_v9 = vsel %vm316_vm1, %v912_v7, 0  ;;  %v4071_v25 = vand.u32 4294901760, %v1011_v20  ;;  %v1053_v55 = vsel %vm316_vm1, %v909_v51, 0  ;;  %v4147_v7 = vand.u32 4294901760, %v1050_v2 }
  0x7a   : > { %3562 = vmatprep.subr.mxu0 %v3714_v0  ;;  %3577 = vmatprep.subr.mxu1 %v3714_v0  ;;  %v4051_v12 = vand.u32 4294901760, %v1062_v9  ;;  %v4130_v57 = vand.u32 4294901760, %v1053_v55 }
  0x7b   : > { %3591 = vmatprep.mubr.msk.f32.mxu1 %vm3715_vm0, %v3714_v0  ;;  %v4088_v33 = vsub.f32 %v1011_v20, %v4071_v25  ;;  %v4157_v15 = vsub.f32 %v1050_v2, %v4147_v7 }
  0x7c   : > { %v4067_v23 = vsub.f32 %v1062_v9, %v4051_v12  ;;  %v4136_v61 = vsub.f32 %v1053_v55, %v4130_v57 }
  0x7d   : > { %3563 = vmatpush3.xpose.msra.mxu0 %v467_v35  ;;  %3578 = vmatpush3.xpose.msra.mxu1 %v3826_v10  ;;  %v896_v10 = vld [vmem:[%s4027_s24 + $0x70] sm:$0xff]  ;;  %v5210_v28 = vand.u32 4294901760, %v4157_v15 }
  0x7e   : > { %3564 = vmatprep.subr.mxu0 %v3714_v0  ;;  %3579 = vmatprep.subr.mxu1 %v3714_v0  ;;  %v5225_v31 = vand.u32 4294901760, %v4067_v23 }
  0x81   : > { %3565 = vmatpush3.xpose.msra.mxu0 %v474_v43  ;;  %3580 = vmatpush3.xpose.msra.mxu1 %v3828_v11  ;;  %v5228_v11 = vand.u32 4294901760, %v4040_v6 }
  0x82   : > { %3566 = vmatprep.subr.mxu0 %v3714_v0  ;;  %3581 = vmatprep.subr.mxu1 %v3714_v0 }
  0x83   : > { %v1387_v22 = vsub.f32 %v4040_v6, %v5228_v11 }
  0x85   : > { %3567 = vmatpush3.xpose.msra.mxu0 %v481_v49  ;;  %3582 = vmatpush3.xpose.msra.mxu1 %v3831_v13  ;;  %v1014_v13 = vsel %vm316_vm1, %v896_v10, 0  ;;  %v5212_v10 = vand.u32 4294901760, %v4141_v1 }
  0x86   : > { %3568 = vmatprep.subr.mxu0 %v3714_v0  ;;  %3583 = vmatprep.subr.mxu1 %v3714_v0  ;;  %v4058_v18 = vand.u32 4294901760, %v1014_v13 }
  0x87   : > { %v1303_v19 = vsub.f32 %v4141_v1, %v5212_v10 }
  0x88   : > { %v4078_v27 = vsub.f32 %v1014_v13, %v4058_v18 }
  0x89   : > { %3569 = vmatpush3.xpose.msra.mxu0 %v488_v54  ;;  %3584 = vmatpush3.xpose.msra.mxu1 %v3848_v21  ;;  %v894_v21 = vld [vmem:[%s4027_s24 + $0x60] sm:$0xff] }
  0x8a   : > { %3570 = vmatprep.subr.mxu0 %v3714_v0  ;;  %3585 = vmatprep.subr.mxu1 %v3714_v0  ;;  %v1008_v29 = vsel %vm316_vm1, %v894_v21, 0  ;;  %v5222_v35 = vand.u32 4294901760, %v4078_v27  ;;  %v1047_v21 = vsel %vm316_vm1, %v907_v16, 0 }
  0x8b   : > { %v4094_v37 = vand.u32 4294901760, %v1008_v29 }
  0x8c   : > { %v1282_v41 = vsub.f32 %v4078_v27, %v5222_v35 }
  0x8d   : > { %3571 = vmatpush3.xpose.msra.mxu0 %v495_v59  ;;  %3586 = vmatpush3.xpose.msra.mxu1 %v3867_v30  ;;  %v1388_v30 = vand.u32 4294901760, %v1387_v22  ;;  %v4108_v43 = vsub.f32 %v1008_v29, %v4094_v37  ;;  %v1409_v59 = vand.u32 4294901760, %v1408_v53  ;;  %v891_v22 = vld [vmem:[%s4027_s24 + $0x48] sm:$0xff]  ;;  %v4171_v29 = vand.u32 4294901760, %v1047_v21 }
  0x8e   : > { %3587 = vmatprep.subr.mxu1 %v3714_v0  ;;  %3072 = vmatprep.subr.mxu0 %v4033_v4  ;;  %v1283_v47 = vand.u32 4294901760, %v1282_v41 }
  0x8f   : > { %v5215_v49 = vand.u32 4294901760, %v4108_v43 }
  0x90   : > { %3573 = vmatmul.mubr.f32.vlgmr.msra.gmra.mxu0 %v3885_v40 }
  0x91   : > { %3588 = vmatpush3.xpose.msra.mxu1 %v3882_v38  ;;  %v1394_v38 = vsub.f32 %v4067_v23, %v5225_v31  ;;  %v1296_v54 = vsub.f32 %v4108_v43, %v5215_v49 }
  0x92   : > { %3589 = vmatprep.subr.mxu1 %v3714_v0  ;;  %v1017_v0 = vsel %vm316_vm1, %v897_v3, 0  ;;  %v892_v3 = vld [vmem:[%s4027_s24 + $0x50] sm:$0xff] }
  0x93   : > { %v4036_v5 = vand.u32 4294901760, %v1017_v0  ;;  %v1395_v44 = vand.u32 4294901760, %v1394_v38  ;;  %v1297_v63 = vand.u32 4294901760, %v1296_v54  ;;  %v1002_v9 = vsel %vm316_vm1, %v892_v3, 0  ;;  %v905_v3 = vld [vmem:[%s4027_s24 + $0xb8] sm:$0xff] }
  0x94   : > { %v4151_v13 = vand.u32 4294901760, %v1002_v9  ;;  %v1041_v16 = vsel %vm316_vm1, %v905_v3, 0 }
  0x95   : > { %3590 = vmatpush3.xpose.msra.mxu1 %v3897_v45  ;;  %v4045_v8 = vsub.f32 %v1017_v0, %v4036_v5  ;;  %3073 = vmatpush3.xpose.msra.mxu0 %v4036_v5  ;;  %v1401_v45 = vsub.f32 %v4085_v32, %v5221_v39  ;;  %v5214_v0 = vand.u32 4294901760, %v4136_v61  ;;  %v901_v39 = vld [vmem:[%s4027_s24 + $0x98] sm:$0xff] }
  0x96   : > { %3074 = vmatprep.subr.mxu0 %v4051_v12  ;;  %3106 = vmatprep.subr.mxu1 %v1388_v30  ;;  %v4165_v20 = vsub.f32 %v1002_v9, %v4151_v13  ;;  %v999_v30 = vsel %vm316_vm1, %v891_v22, 0  ;;  %v1029_v35 = vsel %vm316_vm1, %v901_v39, 0  ;;  %v900_v39 = vld [vmem:[%s4027_s24 + $0x90] sm:$0xff] }
  0x97   : > { %v5227_v17 = vand.u32 4294901760, %v4045_v8  ;;  %v1402_v50 = vand.u32 4294901760, %v1401_v45  ;;  %v1415_v14 = vsub.f32 %v4136_v61, %v5214_v0  ;;  %v4175_v41 = vand.u32 4294901760, %v999_v30 }
  0x98   : > { %3592 = vmatmul.mubr.f32.vlgmr.msra.gmra.mxu1 %v3885_v40  ;;  %v5219_v40 = vand.u32 4294901760, %v4088_v33  ;;  %v5209_v38 = vand.u32 4294901760, %v4165_v20  ;;  %v4181_v45 = vsub.f32 %v1047_v21, %v4171_v29 }
  0x99   : > { %v1275_v26 = vsub.f32 %v4045_v8, %v5227_v17  ;;  %3075 = vmatpush3.xpose.msra.mxu0 %v4058_v18 }
  0x9a   : > { %3076 = vmatprep.subr.mxu0 %v4069_v24  ;;  %v1289_v46 = vsub.f32 %v4088_v33, %v5219_v40  ;;  %v5208_v54 = vand.u32 4294901760, %v4181_v45 }
  0x9b   : > { %v1276_v34 = vand.u32 4294901760, %v1275_v26  ;;  %v1416_v26 = vand.u32 4294901760, %v1415_v14 }
  0x9c   : > { %v1290_v52 = vand.u32 4294901760, %v1289_v46  ;;  %v906_v46 = vld [vmem:[%s4027_s24 + $0xc0] sm:$0xff] }
  0x9d   : > { %3107 = vmatpush3.xpose.msra.mxu1 %v1276_v34  ;;  %3077 = vmatpush3.xpose.msra.mxu0 %v4071_v25  ;;  %v1304_v34 = vand.u32 4294901760, %v1303_v19  ;;  %v1044_v51 = vsel %vm316_vm1, %v906_v46, 0  ;;  %v889_v19 = vld [vmem:[%s4027_s24 + $0x38] sm:$0xff] }
  0x9e   : > { %3078 = vmatprep.subr.mxu0 %v4092_v36  ;;  %3108 = vmatprep.subr.mxu1 %v1395_v44  ;;  %v1422_v44 = vsub.f32 %v4157_v15, %v5210_v28  ;;  %v4195_v55 = vand.u32 4294901760, %v1044_v51 }
  0xa0   : > { %v1423_v53 = vand.u32 4294901760, %v1422_v44  ;;  %v4205_v2 = vsub.f32 %v1044_v51, %v4195_v55 }
  0xa1   : > { %3109 = vmatpush3.xpose.msra.mxu1 %v1283_v47  ;;  %3079 = vmatpush3.xpose.msra.mxu0 %v4094_v37  ;;  %v1310_v47 = vsub.f32 %v4165_v20, %v5209_v38 }
  0xa2   : > { %3110 = vmatprep.subr.mxu1 %v1402_v50  ;;  %3080 = vmatprep.subr.mxu0 %v4130_v57  ;;  %v4189_v50 = vsub.f32 %v999_v30, %v4175_v41  ;;  %v5205_v22 = vand.u32 4294901760, %v4205_v2  ;;  %v993_v30 = vsel %vm316_vm1, %v889_v19, 0 }
  0xa3   : > { %v1311_v58 = vand.u32 4294901760, %v1310_v47  ;;  %v4223_v46 = vand.u32 4294901760, %v993_v30 }
  0xa4   : > { %v1436_v47 = vsub.f32 %v4205_v2, %v5205_v22 }
  0xa5   : > { %3111 = vmatpush3.xpose.msra.mxu1 %v1290_v52  ;;  %3081 = vmatpush3.xpose.msra.mxu0 %v4133_v60  ;;  %v890_v52 = vld [vmem:[%s4027_s24 + $0x40] sm:$0xff] }
  0xa6   : > { %3112 = vmatprep.subr.mxu1 %v1409_v59  ;;  %3082 = vmatprep.subr.mxu0 %v4147_v7  ;;  %v996_v56 = vsel %vm316_vm1, %v890_v52, 0  ;;  %v5207_v59 = vand.u32 4294901760, %v4189_v50  ;;  %v904_v52 = vld [vmem:[%s4027_s24 + $0xb0] sm:$0xff]  ;;  %v1437_v3 = vand.u32 4294901760, %v1436_v47 }
  0xa7   : > { %v4199_v62 = vand.u32 4294901760, %v996_v56 }
  0xa8   : > { %v1317_v9 = vsub.f32 %v4189_v50, %v5207_v59  ;;  %v902_v59 = vld [vmem:[%s4027_s24 + $0xa0] sm:$0xff] }
  0xa9   : > { %3113 = vmatpush3.xpose.msra.mxu1 %v1297_v63  ;;  %3083 = vmatpush3.xpose.msra.mxu0 %v4151_v13  ;;  %v1429_v63 = vsub.f32 %v4181_v45, %v5208_v54  ;;  %v4213_v14 = vsub.f32 %v996_v56, %v4199_v62  ;;  %v4237_v56 = vsub.f32 %v993_v30, %v4223_v46 }
  0xaa   : > { %3114 = vmatprep.subr.mxu1 %v1416_v26  ;;  %3084 = vmatprep.subr.mxu0 %v4171_v29  ;;  %v4219_v26 = vand.u32 4294901760, %v1041_v16 }
  0xab   : > { %v1430_v21 = vand.u32 4294901760, %v1429_v63  ;;  %v5206_v44 = vand.u32 4294901760, %v4213_v14  ;;  %v888_v63 = vld [vmem:[%s4027_s24 + $0x30] sm:$0xff] }
  0xac   : > { %v4229_v51 = vsub.f32 %v1041_v16, %v4219_v26  ;;  %v990_v19 = vsel %vm316_vm1, %v888_v63, 0 }
  0xad   : > { %3115 = vmatpush3.xpose.msra.mxu1 %v1304_v34  ;;  %3085 = vmatpush3.xpose.msra.mxu0 %v4175_v41  ;;  %v1318_v34 = vand.u32 4294901760, %v1317_v9  ;;  %v4249_v30 = vand.u32 4294901760, %v990_v19 }
  0xae   : > { %3116 = vmatprep.subr.mxu1 %v1423_v53  ;;  %3086 = vmatprep.subr.mxu0 %v4195_v55  ;;  %v1324_v53 = vsub.f32 %v4213_v14, %v5206_v44  ;;  %v5211_v9 = vand.u32 4294901760, %v4229_v51  ;;  %v5213_v44 = vand.u32 4294901760, %v4237_v56 }
  0xb0   : > { %v1325_v22 = vand.u32 4294901760, %v1324_v53  ;;  %v1443_v47 = vsub.f32 %v4229_v51, %v5211_v9  ;;  %v886_v53 = vld [vmem:[%s4027_s24 + $0x20] sm:$0xff] }
  0xb1   : > { %3117 = vmatpush3.xpose.msra.mxu1 %v1311_v58  ;;  %3087 = vmatpush3.xpose.msra.mxu0 %v4199_v62  ;;  %v1038_v58 = vsel %vm316_vm1, %v904_v52, 0 }
  0xb2   : > { %3118 = vmatprep.subr.mxu1 %v1430_v21  ;;  %3088 = vmatprep.subr.mxu0 %v4219_v26  ;;  %v4243_v16 = vand.u32 4294901760, %v1038_v58  ;;  %v903_v21 = vld [vmem:[%s4027_s24 + $0xa8] sm:$0xff]  ;;  %v1444_v9 = vand.u32 4294901760, %v1443_v47 }
  0xb3   : > { %v1035_v52 = vsel %vm316_vm1, %v903_v21, 0  ;;  %v1331_v21 = vsub.f32 %v4237_v56, %v5213_v44 }
  0xb4   : > { %v4257_v54 = vsub.f32 %v1038_v58, %v4243_v16  ;;  %v4259_v38 = vand.u32 4294901760, %v1035_v52  ;;  %v1032_v58 = vsel %vm316_vm1, %v902_v59, 0  ;;  %v984_v59 = vsel %vm316_vm1, %v886_v53, 0 }
  0xb5   : > { %3119 = vmatpush3.xpose.msra.mxu1 %v1318_v34  ;;  %3089 = vmatpush3.xpose.msra.mxu0 %v4223_v46  ;;  %v887_v34 = vld [vmem:[%s4027_s24 + $0x28] sm:$0xff]  ;;  %v1332_v44 = vand.u32 4294901760, %v1331_v21  ;;  %v4293_v48 = vand.u32 4294901760, %v984_v59 }
  0xb6   : > { %3120 = vmatprep.subr.mxu1 %v1437_v3  ;;  %v987_v63 = vsel %vm316_vm1, %v887_v34, 0  ;;  %3090 = vmatprep.subr.mxu0 %v4243_v16  ;;  %v4268_v3 = vsub.f32 %v990_v19, %v4249_v30  ;;  %v5217_v34 = vand.u32 4294901760, %v4257_v54  ;;  %v4276_v10 = vsub.f32 %v1035_v52, %v4259_v38 }
  0xb7   : > { %v4270_v28 = vand.u32 4294901760, %v987_v63 }
  0xb8   : > { %v5218_v19 = vand.u32 4294901760, %v4268_v3  ;;  %v1450_v47 = vsub.f32 %v4257_v54, %v5217_v34  ;;  %v5220_v52 = vand.u32 4294901760, %v4276_v10  ;;  %v4305_v34 = vsub.f32 %v984_v59, %v4293_v48 }
  0xb9   : > { %3121 = vmatpush3.xpose.msra.mxu1 %v1325_v22  ;;  %3091 = vmatpush3.xpose.msra.mxu0 %v4249_v30  ;;  %v4278_v22 = vand.u32 4294901760, %v1032_v58  ;;  %v4283_v0 = vsub.f32 %v987_v63, %v4270_v28 }
  0xba   : > { %3092 = vmatprep.subr.mxu0 %v4259_v38  ;;  %3122 = vmatprep.subr.mxu1 %v1444_v9  ;;  %v1338_v63 = vsub.f32 %v4268_v3, %v5218_v19  ;;  %v1451_v9 = vand.u32 4294901760, %v1450_v47  ;;  %v1457_v21 = vsub.f32 %v4276_v10, %v5220_v52  ;;  %5342 = vst [vmem:[#allocation12_spill] sm:$0xff] %v4305_v34  ;;  %v5226_v52 = vand.u32 4294901760, %v4305_v34 }
  0xbb   : > { %5340 = vst [vmem:[#allocation10_spill] sm:$0xff] %v4283_v0  ;;  %v4291_v49 = vsub.f32 %v1032_v58, %v4278_v22  ;;  %v5223_v53 = vand.u32 4294901760, %v4283_v0 }
  0xbc   : > { %v1458_v40 = vand.u32 4294901760, %v1457_v21  ;;  %v4322_v21 = vand.u32 4294901760, %v1029_v35 }
  0xbd   : > { %5341 = vst [vmem:[#allocation11_spill] sm:$0xff] %v4291_v49  ;;  %3123 = vmatpush3.xpose.msra.mxu1 %v1332_v44  ;;  %3093 = vmatpush3.xpose.msra.mxu0 %v4270_v28  ;;  %v5224_v58 = vand.u32 4294901760, %v4291_v49  ;;  %v1339_v44 = vand.u32 4294901760, %v1338_v63  ;;  %v1345_v19 = vsub.f32 %v4283_v0, %v5223_v53  ;;  %v885_v63 = vld [vmem:[%s4027_s24 + $0x18] sm:$0xff] }
  0xbe   : > { %3094 = vmatprep.subr.mxu0 %v4278_v22  ;;  %3124 = vmatprep.subr.mxu1 %v1451_v9  ;;  %v1352_v9 = vsub.f32 %v4305_v34, %v5226_v52  ;;  %v884_v52 = vld [vmem:[%s4027_s24 + $0x10] sm:$0xff] }
  0xbf   : > { %v1464_v47 = vsub.f32 %v4291_v49, %v5224_v58  ;;  %v1346_v59 = vand.u32 4294901760, %v1345_v19  ;;  %v981_v58 = vsel %vm316_vm1, %v885_v63, 0  ;;  %v4328_v19 = vsub.f32 %v1029_v35, %v4322_v21  ;;  %v883_v49 = vld [vmem:[%s4027_s24 + $0x8] sm:$0xff] }
  0xc0   : > { %v4325_v31 = vand.u32 4294901760, %v981_v58  ;;  %v978_v17 = vsel %vm316_vm1, %v884_v52, 0 }
  0xc1   : > { %3125 = vmatpush3.xpose.msra.mxu1 %v1339_v44  ;;  %3095 = vmatpush3.xpose.msra.mxu0 %v4293_v48  ;;  %v1465_v53 = vand.u32 4294901760, %v1464_v47  ;;  %5344 = vst [vmem:[#allocation14_spill] sm:$0xff] %v4328_v19  ;;  %v1026_v47 = vsel %vm316_vm1, %v900_v39, 0  ;;  %v5233_v63 = vand.u32 4294901760, %v4328_v19  ;;  %v899_v39 = vld [vmem:[%s4027_s24 + $0x88] sm:$0xff] }
  0xc2   : > { %3126 = vmatprep.subr.mxu1 %v1458_v40  ;;  %5343 = vst [vmem:[#allocation13_spill] sm:$0xff] %v4325_v31  ;;  %3096 = vmatprep.subr.mxu0 %v4322_v21  ;;  %v1353_v40 = vand.u32 4294901760, %v1352_v9  ;;  %v4333_v44 = vsub.f32 %v981_v58, %v4325_v31  ;;  %v4339_v35 = vand.u32 4294901760, %v1026_v47  ;;  %v1023_v34 = vsel %vm316_vm1, %v899_v39, 0 }
  0xc3   : > { %v1471_v58 = vsub.f32 %v4328_v19, %v5233_v63  ;;  %v4363_v19 = vand.u32 4294901760, %v1023_v34 }
  0xc4   : > { %5345 = vst [vmem:[#allocation15_spill] sm:$0xff] %v4333_v44  ;;  %5346 = vst [vmem:[#allocation16_spill] sm:$0xff] %v4339_v35  ;;  %v5240_v11 = vand.u32 4294901760, %v4333_v44  ;;  %v4349_v9 = vsub.f32 %v1026_v47, %v4339_v35 }
  0xc5   : > { %3127 = vmatpush3.xpose.msra.mxu1 %v1346_v59  ;;  %3097 = vmatpush3.xpose.msra.mxu0 %v4325_v31  ;;  %v4343_v59 = vand.u32 4294901760, %v978_v17  ;;  %v1472_v63 = vand.u32 4294901760, %v1471_v58  ;;  %5350 = vst [vmem:[#allocation20_spill] sm:$0xff] %v4363_v19  ;;  %v4373_v39 = vsub.f32 %v1023_v34, %v4363_v19  ;;  %v898_v58 = vld [vmem:[%s4027_s24 + $0x80] sm:$0xff] }
  0xc6   : > { %3128 = vmatprep.subr.mxu1 %v1465_v53  ;;  %5348 = vst [vmem:[#allocation18_spill] sm:$0xff] %v4349_v9  ;;  %3098 = vmatprep.subr.mxu0 %v4339_v35  ;;  %v1359_v52 = vsub.f32 %v4333_v44, %v5240_v11  ;;  %v5243_v47 = vand.u32 4294901760, %v4349_v9  ;;  %v882_v44 = vld [vmem:[%s4027_s24] sm:$0xff] }
  0xc7   : > { %5347 = vst [vmem:[#allocation17_spill] sm:$0xff] %v4343_v59  ;;  %v4357_v53 = vsub.f32 %v978_v17, %v4343_v59  ;;  %5352 = vst [vmem:[#allocation22_spill] sm:$0xff] %v4373_v39  ;;  %v5252_v34 = vand.u32 4294901760, %v4373_v39 }
  0xc8   : > { %v1360_v35 = vand.u32 4294901760, %v1359_v52  ;;  %v1478_v17 = vsub.f32 %v4349_v9, %v5243_v47 }
  0xc9   : > { %3129 = vmatpush3.xpose.msra.mxu1 %v1353_v40  ;;  %5349 = vst [vmem:[#allocation19_spill] sm:$0xff] %v4357_v53  ;;  %3099 = vmatpush3.xpose.msra.mxu0 %v4343_v59  ;;  %v975_v40 = vsel %vm316_vm1, %v883_v49, 0  ;;  %v5254_v31 = vand.u32 4294901760, %v4357_v53 }
  0xca   : > { %v4367_v11 = vand.u32 4294901760, %v975_v40  ;;  %3130 = vmatprep.subr.mxu1 %v1472_v63  ;;  %3100 = vmatprep.subr.mxu0 %v4363_v19  ;;  %v1020_v63 = vsel %vm316_vm1, %v898_v58, 0  ;;  %v1479_v47 = vand.u32 4294901760, %v1478_v17  ;;  %v972_v19 = vsel %vm316_vm1, %v882_v44, 0 }
  0xcb   : > { %v1366_v49 = vsub.f32 %v4357_v53, %v5254_v31  ;;  %v4387_v9 = vand.u32 4294901760, %v1020_v63  ;;  %v4391_v0 = vand.u32 4294901760, %v972_v19 }
  0xcc   : > { %5351 = vst [vmem:[#allocation21_spill] sm:$0xff] %v4367_v11  ;;  %v4381_v52 = vsub.f32 %v975_v40, %v4367_v11  ;;  %v1485_v40 = vsub.f32 %v4373_v39, %v5252_v34 }
  0xcd   : > { %3131 = vmatpush3.xpose.msra.mxu1 %v1360_v35  ;;  %3101 = vmatpush3.xpose.msra.mxu0 %v4367_v11  ;;  %5354 = vst [vmem:[#allocation24_spill] sm:$0xff] %v4387_v9  ;;  %v1367_v35 = vand.u32 4294901760, %v1366_v49  ;;  %5355 = vst [vmem:[#allocation25_spill] sm:$0xff] %v4391_v0  ;;  %v4397_v58 = vsub.f32 %v1020_v63, %v4387_v9  ;;  %v4404_v17 = vsub.f32 %v972_v19, %v4391_v0 }
  0xce   : > { %5353 = vst [vmem:[#allocation23_spill] sm:$0xff] %v4381_v52  ;;  %v5253_v59 = vand.u32 4294901760, %v4381_v52  ;;  %3132 = vmatprep.subr.mxu1 %v1479_v47  ;;  %3102 = vmatprep.subr.mxu0 %v4387_v9  ;;  %v1486_v47 = vand.u32 4294901760, %v1485_v40 }
  0xcf   : > { %5356 = vst [vmem:[#allocation26_spill] sm:$0xff] %v4397_v58  ;;  %5357 = vst [vmem:[#allocation27_spill] sm:$0xff] %v4404_v17  ;;  %v5262_v49 = vand.u32 4294901760, %v4397_v58  ;;  %v5263_v63 = vand.u32 4294901760, %v4404_v17 }
  0xd0   : > { %v1373_v44 = vsub.f32 %v4381_v52, %v5253_v59 }
  0xd1   : > { %3133 = vmatpush3.xpose.msra.mxu1 %v1367_v35  ;;  %3103 = vmatpush3.xpose.msra.mxu0 %v4391_v0  ;;  %v1492_v35 = vsub.f32 %v4397_v58, %v5262_v49  ;;  %v1380_v19 = vsub.f32 %v4404_v17, %v5263_v63 }
  0xd2   : > { %3140 = vmatprep.subr.mxu0 %v4040_v6  ;;  %v1374_v34 = vand.u32 4294901760, %v1373_v44  ;;  %3134 = vmatprep.subr.mxu1 %v1486_v47 }
  0xd3   : > { %v1493_v59 = vand.u32 4294901760, %v1492_v35  ;;  %v1381_v40 = vand.u32 4294901760, %v1380_v19 }
  0xd5   : > { %3135 = vmatpush3.xpose.msra.mxu1 %v1374_v34  ;;  %v3010_v34 = vld [vmem:[%s286_s9] ss:$0 sm:$0xff]  ;;  %s3653_s9 = sshll.u32 %s3717_s8, 4  ;;  %s3654_s9 = int_to_ptr.vmem [resolvable:$false] %s3653_s9 }
  0xd6   : > { %3136 = vmatprep.subr.mxu1 %v1493_v59  ;;  %s3655_s29 = scalar_lea.vmem %s3654_s9, 256  ;;  %p3656_p8 = scmp.lt.s32.totalorder %s2912_s21, %s3654_s9 }
  0xd7   : > { %p3657_p9 = scmp.lt.s32.totalorder %s3655_s29, %s3649_s30 }
  0xd9   : > { %3137 = vmatpush3.xpose.msra.mxu1 %v1381_v40  ;;  %p3658_p12 = por %p3657_p9, %p3656_p8 }
  0xda   : > { %3174 = vmatprep.subr.mxu1 %v4033_v4 }
  0xdb   : > { %p3659_p13 = pnand %p3658_p12, %p3652_p7 }
 0x110   : > { %v423_v44 = vpop.f32.mrf.mxu0 }
 0x111   : > { %v424_v59 = vadd.f32 %v3010_v34, %v423_v44  ;;  %v5362_v44 = vld [vmem:[#allocation16_spill] sm:$0xff]  ;;  %v5364_v34 = vld [vmem:[#allocation17_spill] sm:$0xff] }
 0x112   : > { %v3498_v31 = vpop.f32.mrf.mxu0 }
 0x118   : > { %v534_v6 = vpop.f32.mrf.mxu1 }
 0x119   : > { %v535_v19 = vadd.f32 %v534_v6, %v424_v59  ;;  %v5365_v59 = vld [vmem:[#allocation14_spill] sm:$0xff] }
 0x11a   : > { %v3517_v52 = vpop.f32.mrf.mxu1 }
 0x130   : > { %v622_v47 = vpop.f32.mrf.mxu0 }
 0x131   : > { %v623_v63 = vadd.f32 %v622_v47, %v535_v19  ;;  %v5363_v47 = vld [vmem:[#allocation12_spill] sm:$0xff]  ;;  %v5367_v19 = vld [vmem:[#allocation15_spill] sm:$0xff] }
 0x132   : > { %v3536_v39 = vpop.f32.mrf.mxu0 }
 0x138   : > { %v703_v0 = vpop.f32.mrf.mxu1 }
 0x139   : > { %v704_v31 = vadd.f32 %v703_v0, %v623_v63  ;;  %v5361_v63 = vld [vmem:[#allocation11_spill] sm:$0xff] }
 0x13a   : > { %v3555_v49 = vpop.f32.mrf.mxu1 }
 0x150   : > { %v798_v35 = vpop.f32.mrf.mxu0 }
 0x151   : > { %v799_v17 = vadd.f32 %v798_v35, %v704_v31  ;;  %v5366_v35 = vld [vmem:[#allocation20_spill] sm:$0xff] }
 0x152   : > { %v3574_v40 = vpop.f32.mrf.mxu0  ;;  %v5369_v31 = vld [vmem:[#allocation24_spill] sm:$0xff] }
 0x153   : > { %v5368_v40 = vld [vmem:[#allocation18_spill] sm:$0xff] }
 0x158   : > { %v877_v52 = vpop.f32.mrf.mxu1 }
 0x159   : > { %v878_v58 = vadd.f32 %v877_v52, %v799_v17  ;;  %v5360_v17 = vld [vmem:[#allocation13_spill] sm:$0xff]  ;;  %v5370_v52 = vld [vmem:[#allocation19_spill] sm:$0xff] }
 0x15a   : > { %v3593_v39 = vpop.f32.mrf.mxu1 }
 0x15b   : > { %v881_v4 = vmax.f32 %v878_v58, 0.0  ;;  %v5359_v58 = vld [vmem:[#allocation10_spill] sm:$0xff]  ;;  %v5371_v39 = vld [vmem:[#allocation25_spill] sm:$0xff] }
 0x15d   : > { %v969_v49 = vsel %vm316_vm1, %v881_v4, 0 }
 0x15e   : > { %v4422_v53 = vand.u32 4294901760, %v969_v49 }
 0x160   : > { %v4425_v9 = vsub.f32 %v969_v49, %v4422_v53  ;;  %3138 = vmatprep.mubr.f32.mxu1 %v4422_v53  ;;  %v5372_v49 = vld [vmem:[#allocation22_spill] sm:$0xff] }
 0x161   : > { %3139 = vmatmul.mubr.f32.vlgmr.msra.gmra.mxu1 %v4422_v53 }
 0x162   : > { %3175 = vmatpush3.xpose.msra.mxu1 %v4036_v5  ;;  %v4431_v6 = vand.u32 4294901760, %v4425_v9 }
 0x163   : > { %3176 = vmatprep.subr.mxu1 %v4051_v12 }
 0x164   : > { %3206 = vmatprep.mubr.f32.mxu1 %v4431_v6  ;;  %v1263_v4 = vsub.f32 %v4425_v9, %v4431_v6 }
 0x166   : > { %3177 = vmatpush3.xpose.msra.mxu1 %v4058_v18  ;;  %v4438_v0 = vand.u32 4294901760, %v1263_v4  ;;  %v5373_v4 = vld [vmem:[#allocation8_spill] sm:$0xff] }
 0x167   : > { %3178 = vmatprep.subr.mxu1 %v4069_v24 }
 0x168   : > { %5358 = vst [vmem:[#allocation28_spill] sm:$0xff] %v4438_v0  ;;  %3104 = vmatprep.mubr.f32.mxu0 %v4438_v0 }
 0x169   : > { %3105 = vmatmul.mubr.f32.vlgmr.msra.gmra.mxu0 %v4438_v0  ;;  %v5374_v0 = vld [vmem:[#allocation23_spill] sm:$0xff] }
 0x16a   : > { %3141 = vmatpush3.xpose.msra.mxu0 %v4045_v8  ;;  %3179 = vmatpush3.xpose.msra.mxu1 %v4071_v25 }
 0x16b   : > { %3172 = vmatprep.mubr.f32.mxu0 %v4425_v9  ;;  %3142 = vmatprep.subr.mxu0 %v4067_v23 }
 0x16c   : > { %3180 = vmatprep.subr.mxu1 %v4092_v36 }
 0x16e   : > { %3143 = vmatpush3.xpose.msra.mxu0 %v4078_v27  ;;  %3181 = vmatpush3.xpose.msra.mxu1 %v4094_v37 }
 0x16f   : > { %3144 = vmatprep.subr.mxu0 %v4085_v32  ;;  %3182 = vmatprep.subr.mxu1 %v4130_v57 }
 0x172   : > { %3145 = vmatpush3.xpose.msra.mxu0 %v4088_v33  ;;  %3183 = vmatpush3.xpose.msra.mxu1 %v4133_v60 }
 0x173   : > { %3146 = vmatprep.subr.mxu0 %v4105_v42  ;;  %3184 = vmatprep.subr.mxu1 %v4147_v7 }
 0x176   : > { %3147 = vmatpush3.xpose.msra.mxu0 %v4108_v43  ;;  %3185 = vmatpush3.xpose.msra.mxu1 %v4151_v13 }
 0x177   : > { %3148 = vmatprep.subr.mxu0 %v4136_v61  ;;  %3186 = vmatprep.subr.mxu1 %v4171_v29 }
 0x17a   : > { %3149 = vmatpush3.xpose.msra.mxu0 %v4141_v1  ;;  %3187 = vmatpush3.xpose.msra.mxu1 %v4175_v41 }
 0x17b   : > { %3150 = vmatprep.subr.mxu0 %v4157_v15  ;;  %3188 = vmatprep.subr.mxu1 %v4195_v55 }
 0x17e   : > { %3151 = vmatpush3.xpose.msra.mxu0 %v4165_v20  ;;  %3189 = vmatpush3.xpose.msra.mxu1 %v4199_v62 }
 0x17f   : > { %3152 = vmatprep.subr.mxu0 %v4181_v45  ;;  %3190 = vmatprep.subr.mxu1 %v4219_v26 }
 0x182   : > { %3153 = vmatpush3.xpose.msra.mxu0 %v4189_v50  ;;  %3191 = vmatpush3.xpose.msra.mxu1 %v4223_v46 }
 0x183   : > { %3154 = vmatprep.subr.mxu0 %v4205_v2  ;;  %3192 = vmatprep.subr.mxu1 %v4243_v16 }
 0x186   : > { %3155 = vmatpush3.xpose.msra.mxu0 %v4213_v14  ;;  %3193 = vmatpush3.xpose.msra.mxu1 %v4249_v30 }
 0x187   : > { %3156 = vmatprep.subr.mxu0 %v4229_v51  ;;  %3194 = vmatprep.subr.mxu1 %v4259_v38 }
 0x18a   : > { %3157 = vmatpush3.xpose.msra.mxu0 %v4237_v56  ;;  %3195 = vmatpush3.xpose.msra.mxu1 %v4270_v28 }
 0x18b   : > { %3158 = vmatprep.subr.mxu0 %v4257_v54  ;;  %3196 = vmatprep.subr.mxu1 %v4278_v22 }
 0x18e   : > { %3159 = vmatpush3.xpose.msra.mxu0 %v4268_v3  ;;  %3197 = vmatpush3.xpose.msra.mxu1 %v4293_v48 }
 0x18f   : > { %3160 = vmatprep.subr.mxu0 %v4276_v10  ;;  %3198 = vmatprep.subr.mxu1 %v4322_v21 }
 0x192   : > { %3161 = vmatpush3.xpose.msra.mxu0 %v5359_v58  ;;  %3199 = vmatpush3.xpose.msra.mxu1 %v5360_v17 }
 0x193   : > { %3162 = vmatprep.subr.mxu0 %v5361_v63  ;;  %3200 = vmatprep.subr.mxu1 %v5362_v44 }
 0x196   : > { %3163 = vmatpush3.xpose.msra.mxu0 %v5363_v47  ;;  %3201 = vmatpush3.xpose.msra.mxu1 %v5364_v34 }
 0x197   : > { %3164 = vmatprep.subr.mxu0 %v5365_v59  ;;  %3202 = vmatprep.subr.mxu1 %v5366_v35 }
 0x19a   : > { %3165 = vmatpush3.xpose.msra.mxu0 %v5367_v19  ;;  %3203 = vmatpush3.xpose.msra.mxu1 %v4367_v11  ;;  %v5375_v11 = vld [vmem:[#allocation26_spill] sm:$0xff] }
 0x19b   : > { %3166 = vmatprep.subr.mxu0 %v5368_v40  ;;  %3204 = vmatprep.subr.mxu1 %v5369_v31  ;;  %v5376_v31 = vld [vmem:[#allocation27_spill] sm:$0xff] }
 0x19e   : > { %3167 = vmatpush3.xpose.msra.mxu0 %v5370_v52  ;;  %3205 = vmatpush3.xpose.msra.mxu1 %v5371_v39  ;;  %v5377_v39 = vld [vmem:[#allocation9_spill] sm:$0xff] }
 0x19f   : > { %3168 = vmatprep.subr.mxu0 %v5372_v49  ;;  %3242 = vmatprep.subr.mxu1 %v5373_v4  ;;  %v5378_v49 = vand.u32 4294901760, %v5377_v39  ;;  %v5379_v4 = vand.u32 4294901760, %v4045_v8  ;;  %v5383_v8 = vand.u32 4294901760, %v4088_v33  ;;  %v5389_v33 = vand.u32 4294901760, %v4165_v20 }
 0x1a1   : > { %3207 = vmatmul.mubr.f32.vlgmr.msra.gmra.mxu1 %v4431_v6 }
 0x1a2   : > { %3169 = vmatpush3.xpose.msra.mxu0 %v5374_v0  ;;  %3243 = vmatpush3.xpose.msra.mxu1 %v4036_v5  ;;  %v5380_v5 = vand.u32 4294901760, %v4067_v23  ;;  %v5384_v23 = vand.u32 4294901760, %v4105_v42  ;;  %v5392_v42 = vand.u32 4294901760, %v4205_v2 }
 0x1a3   : > { %3274 = vmatprep.mubr.f32.mxu1 %v4422_v53  ;;  %3170 = vmatprep.subr.mxu0 %v5375_v11 }
 0x1a4   : > { %3244 = vmatprep.subr.mxu1 %v4051_v12  ;;  %v5381_v12 = vand.u32 4294901760, %v4078_v27  ;;  %v5387_v27 = vand.u32 4294901760, %v4141_v1  ;;  %v929_v1 = vld [vmem:[%s4027_s24 + $0x178] sm:$0xff] }
 0x1a6   : > { %3171 = vmatpush3.xpose.msra.mxu0 %v5376_v31  ;;  %3245 = vmatpush3.xpose.msra.mxu1 %v4058_v18  ;;  %v5382_v18 = vand.u32 4294901760, %v4085_v32  ;;  %v5388_v32 = vand.u32 4294901760, %v4157_v15  ;;  %v5396_v15 = vand.u32 4294901760, %v4257_v54 }
 0x1a7   : > { %3208 = vmatprep.subr.mxu0 %v5378_v49  ;;  %3246 = vmatprep.subr.mxu1 %v4069_v24  ;;  %v5385_v24 = vand.u32 4294901760, %v4108_v43  ;;  %v945_v43 = vld [vmem:[%s4027_s24 + $0x1f8] sm:$0xff] }
 0x1a9   : > { %3173 = vmatmul.mubr.f32.vlgmr.msra.gmra.mxu0 %v4425_v9 }
 0x1aa   : > { %3209 = vmatpush3.xpose.msra.mxu0 %v5379_v4  ;;  %3240 = vmatprep.mubr.f32.mxu0 %v4422_v53  ;;  %v941_v4 = vld [vmem:[%s4027_s24 + $0x1d8] sm:$0xff] }
 0x1ab   : > { %3247 = vmatpush3.xpose.msra.mxu1 %v4071_v25  ;;  %3210 = vmatprep.subr.mxu0 %v5380_v5  ;;  %v5386_v25 = vand.u32 4294901760, %v4136_v61  ;;  %v1161_v61 = vsel %vm316_vm1, %v945_v43, 0  ;;  %v5406_v43 = vld [vmem:[#allocation24_spill] sm:$0xff] }
 0x1ac   : > { %3248 = vmatprep.subr.mxu1 %v4092_v36  ;;  %v5390_v36 = vand.u32 4294901760, %v4181_v45  ;;  %v4570_v20 = vand.u32 4294901760, %v1161_v61  ;;  %v943_v45 = vld [vmem:[%s4027_s24 + $0x1e8] sm:$0xff] }
 0x1ae   : > { %3211 = vmatpush3.xpose.msra.mxu0 %v5381_v12  ;;  %v4585_v54 = vsub.f32 %v1161_v61, %v4570_v20 }
 0x1af   : > { %3249 = vmatpush3.xpose.msra.mxu1 %v4094_v37  ;;  %3212 = vmatprep.subr.mxu0 %v5382_v18  ;;  %v5391_v37 = vand.u32 4294901760, %v4189_v50  ;;  %v5397_v50 = vand.u32 4294901760, %v4268_v3 }
 0x1b0   : > { %3250 = vmatprep.subr.mxu1 %v4130_v57  ;;  %v5393_v57 = vand.u32 4294901760, %v4213_v14  ;;  %v1155_v14 = vsel %vm316_vm1, %v943_v45, 0  ;;  %v5409_v45 = vld [vmem:[#allocation22_spill] sm:$0xff] }
 0x1b1   : > { %v4608_v3 = vand.u32 4294901760, %v1155_v14 }
 0x1b2   : > { %3213 = vmatpush3.xpose.msra.mxu0 %v5383_v8 }
 0x1b3   : > { %3251 = vmatpush3.xpose.msra.mxu1 %v4133_v60  ;;  %3214 = vmatprep.subr.mxu0 %v5384_v23  ;;  %v5394_v60 = vand.u32 4294901760, %v4229_v51  ;;  %v942_v51 = vld [vmem:[%s4027_s24 + $0x1e0] sm:$0xff]  ;;  %v4631_v12 = vsub.f32 %v1155_v14, %v4608_v3  ;;  %v925_v23 = vld [vmem:[%s4027_s24 + $0x158] sm:$0xff] }
 0x1b4   : > { %3252 = vmatprep.subr.mxu1 %v4147_v7  ;;  %v944_v7 = vld [vmem:[%s4027_s24 + $0x1f0] sm:$0xff] }
 0x1b6   : > { %3215 = vmatpush3.xpose.msra.mxu0 %v5385_v24  ;;  %v5403_v24 = vand.u32 4294901760, %v5367_v19 }
 0x1b7   : > { %3253 = vmatpush3.xpose.msra.mxu1 %v4151_v13  ;;  %3216 = vmatprep.subr.mxu0 %v5386_v25  ;;  %v5395_v13 = vand.u32 4294901760, %v4237_v56  ;;  %v5400_v56 = vand.u32 4294901760, %v5361_v63 }
 0x1b8   : > { %3254 = vmatprep.subr.mxu1 %v4171_v29  ;;  %v1113_v29 = vsel %vm316_vm1, %v929_v1, 0  ;;  %v924_v1 = vld [vmem:[%s4027_s24 + $0x150] sm:$0xff] }
 0x1b9   : > { %v1098_v14 = vsel %vm316_vm1, %v924_v1, 0 }
 0x1ba   : > { %3217 = vmatpush3.xpose.msra.mxu0 %v5387_v27 }
 0x1bb   : > { %3255 = vmatpush3.xpose.msra.mxu1 %v4175_v41  ;;  %3218 = vmatprep.subr.mxu0 %v5388_v32  ;;  %v928_v41 = vld [vmem:[%s4027_s24 + $0x170] sm:$0xff] }
 0x1bc   : > { %3256 = vmatprep.subr.mxu1 %v4195_v55  ;;  %v4579_v55 = vand.u32 4294901760, %v1113_v29  ;;  %v1110_v2 = vsel %vm316_vm1, %v928_v41, 0  ;;  %v5408_v41 = vld [vmem:[#allocation25_spill] sm:$0xff] }
 0x1be   : > { %3219 = vmatpush3.xpose.msra.mxu0 %v5389_v33  ;;  %v5404_v33 = vld [vmem:[#allocation21_spill] sm:$0xff] }
 0x1bf   : > { %3257 = vmatpush3.xpose.msra.mxu1 %v4199_v62  ;;  %3220 = vmatprep.subr.mxu0 %v5390_v36 }
 0x1c0   : > { %3258 = vmatprep.subr.mxu1 %v4219_v26  ;;  %v927_v26 = vld [vmem:[%s4027_s24 + $0x168] sm:$0xff] }
 0x1c2   : > { %3221 = vmatpush3.xpose.msra.mxu0 %v5391_v37 }
 0x1c3   : > { %3259 = vmatpush3.xpose.msra.mxu1 %v4223_v46  ;;  %3222 = vmatprep.subr.mxu0 %v5392_v42  ;;  %v5399_v46 = vand.u32 4294901760, %v5359_v58  ;;  %v1152_v58 = vsel %vm316_vm1, %v942_v51, 0  ;;  %v5285_v42 = vand.u32 4294901760, %v4631_v12 }
 0x1c4   : > { %3260 = vmatprep.subr.mxu1 %v4243_v16  ;;  %v5290_v16 = vand.u32 4294901760, %v4585_v54  ;;  %v4635_v8 = vand.u32 4294901760, %v1152_v58 }
 0x1c6   : > { %3223 = vmatpush3.xpose.msra.mxu0 %v5393_v57  ;;  %v2242_v5 = vsub.f32 %v4585_v54, %v5290_v16  ;;  %v4660_v57 = vsub.f32 %v1152_v58, %v4635_v8 }
 0x1c7   : > { %3261 = vmatpush3.xpose.msra.mxu1 %v4249_v30  ;;  %3224 = vmatprep.subr.mxu0 %v5394_v60 }
 0x1c8   : > { %3262 = vmatprep.subr.mxu1 %v4259_v38  ;;  %v1158_v38 = vsel %vm316_vm1, %v944_v7, 0  ;;  %v2243_v36 = vand.u32 4294901760, %v2242_v5  ;;  %v5407_v7 = vand.u32 4294901760, %v5370_v52  ;;  %v5281_v51 = vand.u32 4294901760, %v4660_v57 }
 0x1c9   : > { %v4587_v62 = vand.u32 4294901760, %v1158_v38 }
 0x1ca   : > { %3225 = vmatpush3.xpose.msra.mxu0 %v5395_v13 }
 0x1cb   : > { %3263 = vmatpush3.xpose.msra.mxu1 %v4270_v28  ;;  %3226 = vmatprep.subr.mxu0 %v5396_v15  ;;  %v5398_v28 = vand.u32 4294901760, %v4276_v10  ;;  %v4598_v10 = vand.u32 4294901760, %v1110_v2  ;;  %v4606_v30 = vsub.f32 %v1158_v38, %v4587_v62  ;;  %v939_v38 = vld [vmem:[%s4027_s24 + $0x1c8] sm:$0xff] }
 0x1cc   : > { %3264 = vmatprep.subr.mxu1 %v4278_v22  ;;  %v1107_v22 = vsel %vm316_vm1, %v927_v26, 0  ;;  %v1143_v58 = vsel %vm316_vm1, %v939_v38, 0 }
 0x1cd   : > { %v4618_v39 = vsub.f32 %v1110_v2, %v4598_v10  ;;  %v4620_v49 = vand.u32 4294901760, %v1107_v22 }
 0x1ce   : > { %3227 = vmatpush3.xpose.msra.mxu0 %v5397_v50  ;;  %v5410_v50 = vand.u32 4294901760, %v5409_v45 }
 0x1cf   : > { %3265 = vmatpush3.xpose.msra.mxu1 %v4293_v48  ;;  %3228 = vmatprep.subr.mxu0 %v5398_v28  ;;  %v4596_v48 = vsub.f32 %v1113_v29, %v4579_v55  ;;  %v5287_v25 = vand.u32 4294901760, %v4618_v39  ;;  %v4644_v27 = vsub.f32 %v1107_v22, %v4620_v49  ;;  %v923_v22 = vld [vmem:[%s4027_s24 + $0x148] sm:$0xff] }
 0x1d0   : > { %3266 = vmatprep.subr.mxu1 %v4322_v21  ;;  %v926_v21 = vld [vmem:[%s4027_s24 + $0x160] sm:$0xff] }
 0x1d1   : > { %v5289_v63 = vand.u32 4294901760, %v4596_v48  ;;  %v1104_v18 = vsel %vm316_vm1, %v926_v21, 0  ;;  %v2137_v13 = vsub.f32 %v4618_v39, %v5287_v25  ;;  %v5282_v15 = vand.u32 4294901760, %v4644_v27  ;;  %v938_v21 = vld [vmem:[%s4027_s24 + $0x1c0] sm:$0xff] }
 0x1d2   : > { %3229 = vmatpush3.xpose.msra.mxu0 %v5399_v46  ;;  %v4646_v32 = vand.u32 4294901760, %v1104_v18  ;;  %v2256_v46 = vsub.f32 %v4631_v12, %v5285_v42 }
 0x1d3   : > { %3267 = vmatpush3.xpose.msra.mxu1 %v5360_v17  ;;  %3230 = vmatprep.subr.mxu0 %v5400_v56  ;;  %v5401_v17 = vand.u32 4294901760, %v5363_v47  ;;  %v5288_v47 = vand.u32 4294901760, %v4606_v30  ;;  %v2130_v19 = vsub.f32 %v4596_v48, %v5289_v63 }
 0x1d4   : > { %3268 = vmatprep.subr.mxu1 %v5362_v44  ;;  %v5402_v44 = vand.u32 4294901760, %v5365_v59  ;;  %v940_v59 = vld [vmem:[%s4027_s24 + $0x1d0] sm:$0xff]  ;;  %v4674_v29 = vsub.f32 %v1104_v18, %v4646_v32  ;;  %v4702_v18 = vand.u32 4294901760, %v1098_v14 }
 0x1d5   : > { %v2249_v37 = vsub.f32 %v4606_v30, %v5288_v47  ;;  %v1146_v61 = vsel %vm316_vm1, %v940_v59, 0  ;;  %v2131_v28 = vand.u32 4294901760, %v2130_v19  ;;  %v1140_v59 = vsel %vm316_vm1, %v938_v21, 0  ;;  %v933_v47 = vld [vmem:[%s4027_s24 + $0x198] sm:$0xff] }
 0x1d6   : > { %3231 = vmatpush3.xpose.msra.mxu0 %v5401_v17  ;;  %v4682_v2 = vand.u32 4294901760, %v1146_v61  ;;  %v5411_v17 = vand.u32 4294901760, %v5374_v0  ;;  %v5280_v5 = vand.u32 4294901760, %v4674_v29  ;;  %v4719_v19 = vand.u32 4294901760, %v1143_v58 }
 0x1d7   : > { %3269 = vmatpush3.xpose.msra.mxu1 %v5364_v34  ;;  %3232 = vmatprep.subr.mxu0 %v5402_v44  ;;  %v1149_v34 = vsel %vm316_vm1, %v941_v4, 0  ;;  %v2250_v26 = vand.u32 4294901760, %v2249_v37  ;;  %v2138_v4 = vand.u32 4294901760, %v2137_v13  ;;  %v2144_v44 = vsub.f32 %v4644_v27, %v5282_v15  ;;  %v922_v37 = vld [vmem:[%s4027_s24 + $0x140] sm:$0xff] }
 0x1d8   : > { %3270 = vmatprep.subr.mxu1 %v5366_v35  ;;  %v5405_v35 = vand.u32 4294901760, %v5368_v40  ;;  %v4662_v60 = vand.u32 4294901760, %v1149_v34  ;;  %v1101_v40 = vsel %vm316_vm1, %v925_v23, 0  ;;  %v4709_v0 = vsub.f32 %v1146_v61, %v4682_v2 }
 0x1d9   : > { %v4680_v52 = vand.u32 4294901760, %v1101_v40  ;;  %v1095_v23 = vsel %vm316_vm1, %v923_v22, 0  ;;  %v4725_v61 = vsub.f32 %v1098_v14, %v4702_v18  ;;  %v4729_v1 = vand.u32 4294901760, %v1140_v59 }
 0x1da   : > { %3233 = vmatpush3.xpose.msra.mxu0 %v5403_v24  ;;  %v4690_v56 = vsub.f32 %v1149_v34, %v4662_v60  ;;  %5412 = vst [vmem:[#allocation10_spill] sm:$0xff] %v4709_v0  ;;  %v5413_v24 = vand.u32 4294901760, %v5375_v11  ;;  %v4727_v11 = vand.u32 4294901760, %v1095_v23  ;;  %v2151_v13 = vsub.f32 %v4674_v29, %v5280_v5 }
 0x1db   : > { %3271 = vmatpush3.xpose.msra.mxu1 %v5404_v33  ;;  %3234 = vmatprep.subr.mxu0 %v5405_v35  ;;  %v4706_v34 = vsub.f32 %v1101_v40, %v4680_v52  ;;  %v2257_v33 = vand.u32 4294901760, %v2256_v46  ;;  %v2263_v35 = vsub.f32 %v4660_v57, %v5281_v51  ;;  %v2145_v40 = vand.u32 4294901760, %v2144_v44  ;;  %5415 = vst [vmem:[#allocation13_spill] sm:$0xff] %v4725_v61  ;;  %v5418_v46 = vld [vmem:[#allocation28_spill] sm:$0xff]  ;;  %v919_v51 = vld [vmem:[%s4027_s24 + $0x128] sm:$0xff] }
 0x1dc   : > { %3272 = vmatprep.subr.mxu1 %v5406_v43  ;;  %v5414_v43 = vand.u32 4294901760, %v5376_v31  ;;  %5416 = vst [vmem:[#allocation11_spill] sm:$0xff] %v4729_v1  ;;  %v5276_v38 = vand.u32 4294901760, %v4709_v0  ;;  %v5278_v22 = vand.u32 4294901760, %v4725_v61  ;;  %v4752_v21 = vsub.f32 %v1095_v23, %v4727_v11 }
 0x1dd   : > { %v5277_v31 = vand.u32 4294901760, %v4706_v34  ;;  %v2264_v45 = vand.u32 4294901760, %v2263_v35  ;;  %v2152_v44 = vand.u32 4294901760, %v2151_v13 }
 0x1de   : > { %3235 = vmatpush3.xpose.msra.mxu0 %v5407_v7  ;;  %v937_v7 = vld [vmem:[%s4027_s24 + $0x1b8] sm:$0xff]  ;;  %5419 = vst [vmem:[#allocation12_spill] sm:$0xff] %v4752_v21  ;;  %v2277_v23 = vsub.f32 %v4709_v0, %v5276_v38  ;;  %v5284_v13 = vand.u32 4294901760, %v4752_v21  ;;  %v935_v38 = vld [vmem:[%s4027_s24 + $0x1a8] sm:$0xff] }
 0x1df   : > { %3273 = vmatpush3.xpose.msra.mxu1 %v5408_v41  ;;  %3236 = vmatprep.subr.mxu0 %v5410_v50  ;;  %v1092_v41 = vsel %vm316_vm1, %v922_v37, 0  ;;  %v1137_v14 = vsel %vm316_vm1, %v937_v7, 0  ;;  %v2165_v7 = vsub.f32 %v4725_v61, %v5278_v22  ;;  %v1131_v15 = vsel %vm316_vm1, %v935_v38, 0  ;;  %v915_v61 = vld [vmem:[%s4027_s24 + $0x108] sm:$0xff] }
 0x1e0   : > { %3310 = vmatprep.subr.mxu1 %v2243_v36  ;;  %v5279_v36 = vand.u32 4294901760, %v4690_v56  ;;  %v4768_v35 = vand.u32 4294901760, %v1137_v14  ;;  %v4818_v25 = vand.u32 4294901760, %v1131_v15 }
 0x1e2   : > { %3275 = vmatmul.mubr.f32.vlgmr.msra.gmra.mxu1 %v4422_v53  ;;  %3237 = vmatpush3.xpose.msra.mxu0 %v5411_v17  ;;  %v2270_v50 = vsub.f32 %v4690_v56, %v5279_v36  ;;  %v4755_v17 = vsub.f32 %v1140_v59, %v4729_v1  ;;  %v4790_v36 = vsub.f32 %v1137_v14, %v4768_v35 }
 0x1e3   : > { %3311 = vmatpush3.xpose.msra.mxu1 %v2131_v28  ;;  %3342 = vmatprep.mubr.f32.mxu1 %v4422_v53  ;;  %v4743_v28 = vsub.f32 %v1143_v58, %v4719_v19  ;;  %v4757_v58 = vand.u32 4294901760, %v1092_v41  ;;  %5425 = vst [vmem:[#allocation19_spill] sm:$0xff] %v4818_v25 }
 0x1e4   : > { %3238 = vmatprep.subr.mxu0 %v5413_v24  ;;  %3312 = vmatprep.subr.mxu1 %v2250_v26  ;;  %v921_v26 = vld [vmem:[%s4027_s24 + $0x138] sm:$0xff]  ;;  %5420 = vst [vmem:[#allocation17_spill] sm:$0xff] %v4755_v17  ;;  %v2158_v24 = vsub.f32 %v4706_v34, %v5277_v31  ;;  %5422 = vst [vmem:[#allocation20_spill] sm:$0xff] %v4790_v36  ;;  %v5294_v42 = vand.u32 4294901760, %v4790_v36 }
 0x1e5   : > { %5417 = vst [vmem:[#allocation16_spill] sm:$0xff] %v4743_v28  ;;  %v5283_v59 = vand.u32 4294901760, %v4743_v28  ;;  %v1089_v37 = vsel %vm316_vm1, %v921_v26, 0 }
 0x1e6   : > { %3239 = vmatpush3.xpose.msra.mxu0 %v5414_v43  ;;  %v2159_v26 = vand.u32 4294901760, %v2158_v24  ;;  %v4784_v31 = vand.u32 4294901760, %v1089_v37  ;;  %v2166_v24 = vand.u32 4294901760, %v2165_v7  ;;  %v1083_v7 = vsel %vm316_vm1, %v919_v51, 0 }
 0x1e7   : > { %3313 = vmatpush3.xpose.msra.mxu1 %v2138_v4  ;;  %3276 = vmatprep.subr.mxu0 %v4570_v20  ;;  %v936_v4 = vld [vmem:[%s4027_s24 + $0x1b0] sm:$0xff]  ;;  %v2284_v22 = vsub.f32 %v4743_v28, %v5283_v59  ;;  %v4823_v16 = vand.u32 4294901760, %v1083_v7 }
 0x1e8   : > { %3314 = vmatprep.subr.mxu1 %v2257_v33  ;;  %v2271_v33 = vand.u32 4294901760, %v2270_v50  ;;  %v1134_v43 = vsel %vm316_vm1, %v936_v4, 0  ;;  %v4780_v50 = vsub.f32 %v1092_v41, %v4757_v58  ;;  %v2278_v4 = vand.u32 4294901760, %v2277_v23  ;;  %v916_v28 = vld [vmem:[%s4027_s24 + $0x110] sm:$0xff] }
 0x1e9   : > { %3241 = vmatmul.mubr.f32.vlgmr.msra.gmra.mxu0 %v4422_v53  ;;  %v4792_v5 = vand.u32 4294901760, %v1134_v43  ;;  %v2172_v23 = vsub.f32 %v4752_v21, %v5284_v13  ;;  %v4808_v38 = vsub.f32 %v1089_v37, %v4784_v31  ;;  %v2285_v13 = vand.u32 4294901760, %v2284_v22  ;;  %5426 = vst [vmem:[#allocation8_spill] sm:$0xff] %v4823_v16 }
 0x1ea   : > { %3277 = vmatpush3.xpose.msra.mxu0 %v4579_v55  ;;  %3308 = vmatprep.mubr.f32.mxu0 %v5418_v46  ;;  %5421 = vst [vmem:[#allocation14_spill] sm:$0xff] %v4780_v50 }
 0x1eb   : > { %3315 = vmatpush3.xpose.msra.mxu1 %v2145_v40  ;;  %3278 = vmatprep.subr.mxu0 %v4587_v62  ;;  %v920_v40 = vld [vmem:[%s4027_s24 + $0x130] sm:$0xff]  ;;  %5423 = vst [vmem:[#allocation15_spill] sm:$0xff] %v4808_v38  ;;  %v2173_v37 = vand.u32 4294901760, %v2172_v23  ;;  %v2298_v23 = vsub.f32 %v4790_v36, %v5294_v42 }
 0x1ec   : > { %3316 = vmatprep.subr.mxu1 %v2264_v45  ;;  %v5286_v45 = vand.u32 4294901760, %v4755_v17  ;;  %v1086_v41 = vsel %vm316_vm1, %v920_v40, 0  ;;  %v932_v42 = vld [vmem:[%s4027_s24 + $0x190] sm:$0xff] }
 0x1ed   : > { %v4810_v40 = vand.u32 4294901760, %v1086_v41  ;;  %v2299_v36 = vand.u32 4294901760, %v2298_v23  ;;  %v931_v23 = vld [vmem:[%s4027_s24 + $0x188] sm:$0xff] }
 0x1ee   : > { %3279 = vmatpush3.xpose.msra.mxu0 %v4598_v10  ;;  %v2291_v14 = vsub.f32 %v4755_v17, %v5286_v45  ;;  %v4816_v45 = vsub.f32 %v1134_v43, %v4792_v5  ;;  %v5303_v43 = vand.u32 4294901760, %v4808_v38  ;;  %v1125_v17 = vsel %vm316_vm1, %v933_v47, 0 }
 0x1ef   : > { %3317 = vmatpush3.xpose.msra.mxu1 %v2152_v44  ;;  %3280 = vmatprep.subr.mxu0 %v4608_v3  ;;  %v934_v44 = vld [vmem:[%s4027_s24 + $0x1a0] sm:$0xff] }
 0x1f0   : > { %3318 = vmatprep.subr.mxu1 %v2271_v33  ;;  %v5293_v33 = vand.u32 4294901760, %v4780_v50  ;;  %v1128_v59 = vsel %vm316_vm1, %v934_v44, 0  ;;  %5424 = vst [vmem:[#allocation18_spill] sm:$0xff] %v4816_v45  ;;  %v2292_v63 = vand.u32 4294901760, %v2291_v14  ;;  %v4841_v14 = vsub.f32 %v1131_v15, %v4818_v25 }
 0x1f1   : > { %v4825_v51 = vand.u32 4294901760, %v1128_v59  ;;  %v2186_v47 = vsub.f32 %v4808_v38, %v5303_v43  ;;  %v1074_v38 = vsel %vm316_vm1, %v916_v28, 0 }
 0x1f2   : > { %3281 = vmatpush3.xpose.msra.mxu0 %v4620_v49  ;;  %v2179_v22 = vsub.f32 %v4780_v50, %v5293_v33  ;;  %5429 = vst [vmem:[#allocation27_spill] sm:$0xff] %v4841_v14  ;;  %v917_v33 = vld [vmem:[%s4027_s24 + $0x118] sm:$0xff]  ;;  %v4907_v0 = vand.u32 4294901760, %v1074_v38 }
 0x1f3   : > { %3319 = vmatpush3.xpose.msra.mxu1 %v2159_v26  ;;  %3282 = vmatprep.subr.mxu0 %v4635_v8  ;;  %v918_v26 = vld [vmem:[%s4027_s24 + $0x120] sm:$0xff]  ;;  %5427 = vst [vmem:[#allocation23_spill] sm:$0xff] %v4825_v51  ;;  %v1077_v21 = vsel %vm316_vm1, %v917_v33, 0 }
 0x1f4   : > { %3320 = vmatprep.subr.mxu1 %v2278_v4  ;;  %v4833_v4 = vsub.f32 %v1086_v41, %v4810_v40  ;;  %v1080_v44 = vsel %vm316_vm1, %v918_v26, 0  ;;  %v4847_v41 = vsub.f32 %v1083_v7, %v4823_v16  ;;  %v2180_v15 = vand.u32 4294901760, %v2179_v22 }
 0x1f5   : > { %v4852_v26 = vand.u32 4294901760, %v1080_v44  ;;  %v4860_v7 = vand.u32 4294901760, %v1125_v17  ;;  %v1122_v22 = vsel %vm316_vm1, %v932_v42, 0  ;;  %v4883_v43 = vand.u32 4294901760, %v1077_v21 }
 0x1f6   : > { %3283 = vmatpush3.xpose.msra.mxu0 %v4646_v32  ;;  %5428 = vst [vmem:[#allocation26_spill] sm:$0xff] %v4833_v4  ;;  %5430 = vst [vmem:[#allocation9_spill] sm:$0xff] %v4847_v41  ;;  %v5434_v33 = vand.u32 4294901760, %v4833_v4 }
 0x1f7   : > { %3321 = vmatpush3.xpose.msra.mxu1 %v2166_v24  ;;  %3284 = vmatprep.subr.mxu0 %v4662_v60 }
 0x1f8   : > { %3322 = vmatprep.subr.mxu1 %v2285_v13  ;;  %v4850_v13 = vsub.f32 %v1128_v59, %v4825_v51  ;;  %v5432_v59 = vand.u32 4294901760, %v4816_v45  ;;  %v2193_v42 = vsub.f32 %v4833_v4, %v5434_v33  ;;  %v4905_v4 = vsub.f32 %v1077_v21, %v4883_v43 }
 0x1fa   : > { %3285 = vmatpush3.xpose.msra.mxu0 %v4680_v52  ;;  %5431 = vst [vmem:[#allocation21_spill] sm:$0xff] %v4850_v13  ;;  %v2305_v50 = vsub.f32 %v4816_v45, %v5432_v59  ;;  %v2187_v59 = vand.u32 4294901760, %v2186_v47  ;;  %v1119_v47 = vsel %vm316_vm1, %v931_v23, 0  ;;  %v2194_v28 = vand.u32 4294901760, %v2193_v42 }
 0x1fb   : > { %3323 = vmatpush3.xpose.msra.mxu1 %v2173_v37  ;;  %3286 = vmatprep.subr.mxu0 %v4682_v2  ;;  %v4881_v37 = vsub.f32 %v1125_v17, %v4860_v7  ;;  %v5437_v17 = vand.u32 4294901760, %v4847_v41 }
 0x1fc   : > { %3324 = vmatprep.subr.mxu1 %v2292_v63  ;;  %v4873_v63 = vsub.f32 %v1080_v44, %v4852_v26  ;;  %v2306_v24 = vand.u32 4294901760, %v2305_v50  ;;  %v5436_v44 = vand.u32 4294901760, %v4841_v14 }
 0x1fd   : > { %5435 = vst [vmem:[#allocation25_spill] sm:$0xff] %v4881_v37  ;;  %v2200_v33 = vsub.f32 %v4847_v41, %v5437_v17 }
 0x1fe   : > { %3287 = vmatpush3.xpose.msra.mxu0 %v4702_v18  ;;  %5433 = vst [vmem:[#allocation24_spill] sm:$0xff] %v4873_v63  ;;  %v2312_v45 = vsub.f32 %v4841_v14, %v5436_v44  ;;  %v930_v14 = vld [vmem:[%s4027_s24 + $0x180] sm:$0xff]  ;;  %v1071_v44 = vsel %vm316_vm1, %v915_v61, 0  ;;  %v5439_v21 = vand.u32 4294901760, %v4873_v63  ;;  %v5326_v61 = vand.u32 4294901760, %v4905_v4 }
 0x1ff   : > { %3325 = vmatpush3.xpose.msra.mxu1 %v2180_v15  ;;  %3288 = vmatprep.subr.mxu0 %v4719_v19  ;;  %v4888_v15 = vand.u32 4294901760, %v1122_v22  ;;  %v2201_v42 = vand.u32 4294901760, %v2200_v33 }
 0x200   : > { %3326 = vmatprep.subr.mxu1 %v2299_v36  ;;  %v5438_v36 = vand.u32 4294901760, %v4850_v13  ;;  %v2313_v17 = vand.u32 4294901760, %v2312_v45  ;;  %v5440_v45 = vand.u32 4294901760, %v4881_v37 }
 0x201   : > { %v4910_v41 = vsub.f32 %v1122_v22, %v4888_v15  ;;  %v4929_v22 = vand.u32 4294901760, %v1071_v44 }
 0x202   : > { %3289 = vmatpush3.xpose.msra.mxu0 %v4727_v11  ;;  %v2319_v50 = vsub.f32 %v4850_v13, %v5438_v36  ;;  %v4912_v36 = vand.u32 4294901760, %v1119_v47  ;;  %v914_v13 = vld [vmem:[%s4027_s24 + $0x100] sm:$0xff]  ;;  %s2909_s24 = scalar_lea.hbm %s5204_s6, %s3017_s19 }
 0x203   : > { %3327 = vmatpush3.xpose.msra.mxu1 %v2187_v59  ;;  %3290 = vmatprep.subr.mxu0 %v4729_v1  ;;  %v1116_v59 = vsel %vm316_vm1, %v930_v14, 0  ;;  %v2207_v1 = vsub.f32 %v4873_v63, %v5439_v21  ;;  %v4927_v14 = vsub.f32 %v1074_v38, %v4907_v0  ;;  %v1068_v21 = vsel %vm316_vm1, %v914_v13, 0 }
 0x204   : > { %3328 = vmatprep.subr.mxu1 %v2306_v24  ;;  %v2320_v23 = vand.u32 4294901760, %v2319_v50  ;;  %v2326_v24 = vsub.f32 %v4881_v37, %v5440_v45  ;;  %v4933_v50 = vsub.f32 %v1119_v47, %v4912_v36  ;;  %v2214_v38 = vsub.f32 %v4905_v4, %v5326_v61 }
 0x205   : > { %v2208_v45 = vand.u32 4294901760, %v2207_v1  ;;  %v4945_v33 = vsub.f32 %v1071_v44, %v4929_v22  ;;  %v4947_v47 = vand.u32 4294901760, %v1068_v21  ;;  %v5442_v13 = vand.u32 4294901760, %v4910_v41 }
 0x206   : > { %3291 = vmatpush3.xpose.msra.mxu0 %v4757_v58  ;;  %5441 = vst [vmem:[#allocation22_spill] sm:$0xff] %v4933_v50  ;;  %v2327_v37 = vand.u32 4294901760, %v2326_v24  ;;  %v2215_v44 = vand.u32 4294901760, %v2214_v38 }
 0x207   : > { %3329 = vmatpush3.xpose.msra.mxu1 %v2194_v28  ;;  %3292 = vmatprep.subr.mxu0 %v4768_v35  ;;  %v4935_v28 = vand.u32 4294901760, %v1116_v59  ;;  %v2333_v1 = vsub.f32 %v4910_v41, %v5442_v13  ;;  %v5328_v24 = vand.u32 4294901760, %v4945_v33  ;;  %v4963_v61 = vsub.f32 %v1068_v21, %v4947_v47 }
 0x208   : > { %3330 = vmatprep.subr.mxu1 %v2313_v17  ;;  %v5327_v17 = vand.u32 4294901760, %v4927_v14 }
 0x209   : > { %v4954_v63 = vsub.f32 %v1116_v59, %v4935_v28  ;;  %v2334_v13 = vand.u32 4294901760, %v2333_v1  ;;  %v5329_v21 = vand.u32 4294901760, %v4963_v61 }
 0x20a   : > { %3293 = vmatpush3.xpose.msra.mxu0 %v4784_v31 }
 0x20b   : > { %3331 = vmatpush3.xpose.msra.mxu1 %v2201_v42  ;;  %3294 = vmatprep.subr.mxu0 %v4792_v5  ;;  %v5331_v42 = vand.u32 4294901760, %v4933_v50 }
 0x20c   : > { %3332 = vmatprep.subr.mxu1 %v2320_v23  ;;  %v2221_v23 = vsub.f32 %v4927_v14, %v5327_v17  ;;  %v2228_v17 = vsub.f32 %v4945_v33, %v5328_v24 }
 0x20d   : > { %v2340_v59 = vsub.f32 %v4933_v50, %v5331_v42  ;;  %v5455_v42 = vld [vmem:[#allocation9_spill] sm:$0xff] }
 0x20e   : > { %3295 = vmatpush3.xpose.msra.mxu0 %v4810_v40  ;;  %v2222_v38 = vand.u32 4294901760, %v2221_v23  ;;  %v2235_v23 = vsub.f32 %v4963_v61, %v5329_v21  ;;  %v5453_v21 = vld [vmem:[#allocation26_spill] sm:$0xff] }
 0x20f   : > { %3333 = vmatpush3.xpose.msra.mxu1 %v2208_v45  ;;  %3296 = vmatprep.subr.mxu0 %v4818_v25  ;;  %v5330_v45 = vand.u32 4294901760, %v4954_v63 }
 0x210   : > { %3334 = vmatprep.subr.mxu1 %v2327_v37  ;;  %v2341_v37 = vand.u32 4294901760, %v2340_v59  ;;  %v5446_v59 = vld [vmem:[#allocation16_spill] sm:$0xff] }
 0x211   : > { %v2347_v1 = vsub.f32 %v4954_v63, %v5330_v45  ;;  %v5454_v45 = vld [vmem:[#allocation27_spill] sm:$0xff] }
 0x212   : > { %3297 = vmatpush3.xpose.msra.mxu0 %v4823_v16 }
 0x213   : > { %3335 = vmatpush3.xpose.msra.mxu1 %v2215_v44  ;;  %3298 = vmatprep.subr.mxu0 %v4825_v51  ;;  %v2229_v44 = vand.u32 4294901760, %v2228_v17  ;;  %v2348_v24 = vand.u32 4294901760, %v2347_v1  ;;  %v5444_v17 = vld [vmem:[#allocation11_spill] sm:$0xff]  ;;  %v5449_v1 = vld [vmem:[#allocation14_spill] sm:$0xff] }
 0x214   : > { %3336 = vmatprep.subr.mxu1 %v2334_v13  ;;  %v2236_v13 = vand.u32 4294901760, %v2235_v23  ;;  %v5451_v23 = vld [vmem:[#allocation15_spill] sm:$0xff] }
 0x216   : > { %3299 = vmatpush3.xpose.msra.mxu0 %v4852_v26 }
 0x217   : > { %3337 = vmatpush3.xpose.msra.mxu1 %v2222_v38  ;;  %3300 = vmatprep.subr.mxu0 %v4860_v7  ;;  %v5447_v38 = vld [vmem:[#allocation12_spill] sm:$0xff] }
 0x218   : > { %3338 = vmatprep.subr.mxu1 %v2341_v37  ;;  %v5448_v37 = vld [vmem:[#allocation17_spill] sm:$0xff] }
 0x21a   : > { %3301 = vmatpush3.xpose.msra.mxu0 %v4883_v43 }
 0x21b   : > { %3339 = vmatpush3.xpose.msra.mxu1 %v2229_v44  ;;  %3302 = vmatprep.subr.mxu0 %v4888_v15  ;;  %v5450_v44 = vld [vmem:[#allocation20_spill] sm:$0xff] }
 0x21c   : > { %3340 = vmatprep.subr.mxu1 %v2348_v24  ;;  %v5445_v24 = vld [vmem:[#allocation13_spill] sm:$0xff] }
 0x21e   : > { %3303 = vmatpush3.xpose.msra.mxu0 %v4907_v0 }
 0x21f   : > { %3341 = vmatpush3.xpose.msra.mxu1 %v2236_v13  ;;  %3304 = vmatprep.subr.mxu0 %v4912_v36  ;;  %v5452_v13 = vld [vmem:[#allocation18_spill] sm:$0xff] }
 0x220   : > { %3378 = vmatprep.subr.mxu1 %v4570_v20 }
 0x222   : > { %3343 = vmatmul.mubr.f32.vlgmr.msra.gmra.mxu1 %v4422_v53  ;;  %3305 = vmatpush3.xpose.msra.mxu0 %v4929_v22 }
 0x223   : > { %3379 = vmatpush3.xpose.msra.mxu1 %v4579_v55  ;;  %3410 = vmatprep.mubr.f32.mxu1 %v4431_v6 }
 0x224   : > { %3306 = vmatprep.subr.mxu0 %v4935_v28  ;;  %3380 = vmatprep.subr.mxu1 %v4587_v62 }
 0x226   : > { %3307 = vmatpush3.xpose.msra.mxu0 %v4947_v47 }
 0x227   : > { %3381 = vmatpush3.xpose.msra.mxu1 %v4598_v10  ;;  %3344 = vmatprep.subr.mxu0 %v4585_v54 }
 0x228   : > { %3382 = vmatprep.subr.mxu1 %v4608_v3 }
 0x229   : > { %3309 = vmatmul.mubr.f32.vlgmr.msra.gmra.mxu0 %v5418_v46  ;;  %v5443_v46 = vld [vmem:[#allocation10_spill] sm:$0xff] }
 0x22a   : > { %3345 = vmatpush3.xpose.msra.mxu0 %v4596_v48  ;;  %3376 = vmatprep.mubr.f32.mxu0 %v4425_v9 }
 0x22b   : > { %3383 = vmatpush3.xpose.msra.mxu1 %v4620_v49  ;;  %3346 = vmatprep.subr.mxu0 %v4606_v30 }
 0x22c   : > { %3384 = vmatprep.subr.mxu1 %v4635_v8 }
 0x22e   : > { %3347 = vmatpush3.xpose.msra.mxu0 %v4618_v39 }
 0x22f   : > { %3385 = vmatpush3.xpose.msra.mxu1 %v4646_v32  ;;  %3348 = vmatprep.subr.mxu0 %v4631_v12 }
 0x230   : > { %3386 = vmatprep.subr.mxu1 %v4662_v60 }
 0x232   : > { %3349 = vmatpush3.xpose.msra.mxu0 %v4644_v27 }
 0x233   : > { %3387 = vmatpush3.xpose.msra.mxu1 %v4680_v52  ;;  %3350 = vmatprep.subr.mxu0 %v4660_v57 }
 0x234   : > { %3388 = vmatprep.subr.mxu1 %v4682_v2 }
 0x236   : > { %3351 = vmatpush3.xpose.msra.mxu0 %v4674_v29 }
 0x237   : > { %3389 = vmatpush3.xpose.msra.mxu1 %v4702_v18  ;;  %3352 = vmatprep.subr.mxu0 %v4690_v56 }
 0x238   : > { %3390 = vmatprep.subr.mxu1 %v4719_v19 }
 0x23a   : > { %3353 = vmatpush3.xpose.msra.mxu0 %v4706_v34 }
 0x23b   : > { %3391 = vmatpush3.xpose.msra.mxu1 %v4727_v11  ;;  %3354 = vmatprep.subr.mxu0 %v5443_v46 }
 0x23c   : > { %3392 = vmatprep.subr.mxu1 %v5444_v17 }
 0x23e   : > { %3355 = vmatpush3.xpose.msra.mxu0 %v5445_v24 }
 0x23f   : > { %3393 = vmatpush3.xpose.msra.mxu1 %v4757_v58  ;;  %3356 = vmatprep.subr.mxu0 %v5446_v59 }
 0x240   : > { %3394 = vmatprep.subr.mxu1 %v4768_v35 }
 0x242   : > { %3357 = vmatpush3.xpose.msra.mxu0 %v5447_v38 }
 0x243   : > { %3395 = vmatpush3.xpose.msra.mxu1 %v4784_v31  ;;  %3358 = vmatprep.subr.mxu0 %v5448_v37 }
 0x244   : > { %3396 = vmatprep.subr.mxu1 %v4792_v5 }
 0x246   : > { %3359 = vmatpush3.xpose.msra.mxu0 %v5449_v1 }
 0x247   : > { %3397 = vmatpush3.xpose.msra.mxu1 %v4810_v40  ;;  %3360 = vmatprep.subr.mxu0 %v5450_v44 }
 0x248   : > { %3398 = vmatprep.subr.mxu1 %v4818_v25  ;;  %v5456_v25 = vld [vmem:[#allocation21_spill] sm:$0xff] }
 0x24a   : > { %3361 = vmatpush3.xpose.msra.mxu0 %v5451_v23 }
 0x24b   : > { %3399 = vmatpush3.xpose.msra.mxu1 %v4823_v16  ;;  %3362 = vmatprep.subr.mxu0 %v5452_v13  ;;  %v5457_v16 = vld [vmem:[#allocation24_spill] sm:$0xff] }
 0x24c   : > { %3400 = vmatprep.subr.mxu1 %v4825_v51  ;;  %v5458_v51 = vld [vmem:[#allocation25_spill] sm:$0xff] }
 0x24e   : > { %3363 = vmatpush3.xpose.msra.mxu0 %v5453_v21 }
 0x24f   : > { %3401 = vmatpush3.xpose.msra.mxu1 %v4852_v26  ;;  %3364 = vmatprep.subr.mxu0 %v5454_v45 }
 0x250   : > { %3402 = vmatprep.subr.mxu1 %v4860_v7 }
 0x252   : > { %3365 = vmatpush3.xpose.msra.mxu0 %v5455_v42 }
 0x253   : > { %3403 = vmatpush3.xpose.msra.mxu1 %v4883_v43  ;;  %3366 = vmatprep.subr.mxu0 %v5456_v25 }
 0x254   : > { %3404 = vmatprep.subr.mxu1 %v4888_v15 }
 0x256   : > { %3367 = vmatpush3.xpose.msra.mxu0 %v5457_v16 }
 0x257   : > { %3405 = vmatpush3.xpose.msra.mxu1 %v4907_v0  ;;  %3368 = vmatprep.subr.mxu0 %v5458_v51 }
 0x258   : > { %3406 = vmatprep.subr.mxu1 %v4912_v36 }
 0x25a   : > { %3369 = vmatpush3.xpose.msra.mxu0 %v4905_v4 }
 0x25b   : > { %3407 = vmatpush3.xpose.msra.mxu1 %v4929_v22  ;;  %3370 = vmatprep.subr.mxu0 %v4910_v41 }
 0x25c   : > { %3408 = vmatprep.subr.mxu1 %v4935_v28 }
 0x25e   : > { %3371 = vmatpush3.xpose.msra.mxu0 %v4927_v14 }
 0x25f   : > { %3409 = vmatpush3.xpose.msra.mxu1 %v4947_v47  ;;  %3372 = vmatprep.subr.mxu0 %v4933_v50  ;;  %v5459_v50 = vand.u32 4294901760, %v4585_v54  ;;  %v5463_v54 = vand.u32 4294901760, %v4631_v12  ;;  %v5472_v12 = vand.u32 4294901760, %v5447_v38 }
 0x260   : > { %3446 = vmatprep.subr.mxu1 %v4570_v20  ;;  %v5461_v20 = vand.u32 4294901760, %v4606_v30  ;;  %v5468_v30 = vand.u32 4294901760, %v4706_v34  ;;  %v5484_v34 = vand.u32 4294901760, %v5456_v25  ;;  %v5488_v25 = vand.u32 4294901760, %v4910_v41 }
 0x262   : > { %3411 = vmatmul.mubr.f32.vlgmr.msra.gmra.mxu1 %v4431_v6  ;;  %3373 = vmatpush3.xpose.msra.mxu0 %v4945_v33  ;;  %v5460_v6 = vand.u32 4294901760, %v4596_v48  ;;  %v5466_v48 = vand.u32 4294901760, %v4674_v29  ;;  %v5478_v29 = vld [vmem:[#allocation8_spill] sm:$0xff] }
 0x263   : > { %3447 = vmatpush3.xpose.msra.mxu1 %v4579_v55  ;;  %3478 = vmatprep.mubr.f32.mxu1 %v4422_v53  ;;  %v5462_v55 = vand.u32 4294901760, %v4618_v39  ;;  %v5470_v39 = vand.u32 4294901760, %v5445_v24 }
 0x264   : > { %3374 = vmatprep.subr.mxu0 %v4954_v63  ;;  %3448 = vmatprep.subr.mxu1 %v4587_v62  ;;  %v5465_v62 = vand.u32 4294901760, %v4660_v57  ;;  %v5476_v57 = vld [vmem:[#allocation19_spill] sm:$0xff] }
 0x266   : > { %3375 = vmatpush3.xpose.msra.mxu0 %v4963_v61 }
 0x267   : > { %3449 = vmatpush3.xpose.msra.mxu1 %v4598_v10  ;;  %3412 = vmatprep.subr.mxu0 %v5459_v50  ;;  %v5467_v10 = vand.u32 4294901760, %v4690_v56  ;;  %v5481_v56 = vand.u32 4294901760, %v5453_v21 }
 0x268   : > { %3450 = vmatprep.subr.mxu1 %v4608_v3  ;;  %v5469_v3 = vand.u32 4294901760, %v5443_v46 }
 0x269   : > { %3377 = vmatmul.mubr.f32.vlgmr.msra.gmra.mxu0 %v4425_v9  ;;  %v5464_v9 = vand.u32 4294901760, %v4644_v27  ;;  %v5474_v27 = vand.u32 4294901760, %v5449_v1 }
 0x26a   : > { %3413 = vmatpush3.xpose.msra.mxu0 %v5460_v6  ;;  %3444 = vmatprep.mubr.f32.mxu0 %v4422_v53 }
 0x26b   : > { %3451 = vmatpush3.xpose.msra.mxu1 %v4620_v49  ;;  %3414 = vmatprep.subr.mxu0 %v5461_v20  ;;  %v5471_v49 = vand.u32 4294901760, %v5446_v59 }
 0x26c   : > { %3452 = vmatprep.subr.mxu1 %v4635_v8  ;;  %v5473_v8 = vand.u32 4294901760, %v5448_v37 }
 0x26e   : > { %3415 = vmatpush3.xpose.msra.mxu0 %v5462_v55 }
 0x26f   : > { %3453 = vmatpush3.xpose.msra.mxu1 %v4646_v32  ;;  %3416 = vmatprep.subr.mxu0 %v5463_v54  ;;  %v5475_v32 = vand.u32 4294901760, %v5450_v44 }
 0x270   : > { %3454 = vmatprep.subr.mxu1 %v4662_v60  ;;  %v5477_v60 = vand.u32 4294901760, %v5451_v23 }
 0x272   : > { %3417 = vmatpush3.xpose.msra.mxu0 %v5464_v9 }
 0x273   : > { %3455 = vmatpush3.xpose.msra.mxu1 %v4680_v52  ;;  %3418 = vmatprep.subr.mxu0 %v5465_v62  ;;  %v5479_v52 = vand.u32 4294901760, %v5452_v13 }
 0x274   : > { %3456 = vmatprep.subr.mxu1 %v4682_v2  ;;  %v5480_v2 = vld [vmem:[#allocation23_spill] sm:$0xff] }
 0x276   : > { %3419 = vmatpush3.xpose.msra.mxu0 %v5466_v48 }
 0x277   : > { %3457 = vmatpush3.xpose.msra.mxu1 %v4702_v18  ;;  %3420 = vmatprep.subr.mxu0 %v5467_v10  ;;  %v5483_v18 = vand.u32 4294901760, %v5455_v42 }
 0x278   : > { %3458 = vmatprep.subr.mxu1 %v4719_v19  ;;  %v5485_v19 = vand.u32 4294901760, %v5457_v16  ;;  %v5489_v16 = vand.u32 4294901760, %v4927_v14 }
 0x27a   : > { %3421 = vmatpush3.xpose.msra.mxu0 %v5468_v30 }
 0x27b   : > { %3459 = vmatpush3.xpose.msra.mxu1 %v4727_v11  ;;  %3422 = vmatprep.subr.mxu0 %v5469_v3  ;;  %v5486_v11 = vand.u32 4294901760, %v5458_v51  ;;  %v5494_v51 = vand.u32 4294901760, %v4963_v61 }
 0x27c   : > { %3460 = vmatprep.subr.mxu1 %v5444_v17 }
 0x27e   : > { %3423 = vmatpush3.xpose.msra.mxu0 %v5470_v39 }
 0x27f   : > { %3461 = vmatpush3.xpose.msra.mxu1 %v4757_v58  ;;  %3424 = vmatprep.subr.mxu0 %v5471_v49 }
 0x280   : > { %3462 = vmatprep.subr.mxu1 %v4768_v35  ;;  %v5492_v35 = vand.u32 4294901760, %v4945_v33 }
 0x282   : > { %3425 = vmatpush3.xpose.msra.mxu0 %v5472_v12 }
 0x283   : > { %3463 = vmatpush3.xpose.msra.mxu1 %v4784_v31  ;;  %3426 = vmatprep.subr.mxu0 %v5473_v8  ;;  %v5487_v31 = vand.u32 4294901760, %v4905_v4  ;;  %v1498_v4 = vpop.f32.mrf.mxu1 }
 0x284   : > { %3464 = vmatprep.subr.mxu1 %v4792_v5  ;;  %v5482_v5 = vand.u32 4294901760, %v5454_v45 }
 0x286   : > { %3427 = vmatpush3.xpose.msra.mxu0 %v5474_v27 }
 0x287   : > { %3465 = vmatpush3.xpose.msra.mxu1 %v4810_v40  ;;  %3428 = vmatprep.subr.mxu0 %v5475_v32  ;;  %v5493_v40 = vand.u32 4294901760, %v4954_v63  ;;  %v3716_v32 = vmov 1983009808  }
 0x288   : > { %3466 = vmatprep.subr.mxu1 %v5476_v57  ;;  %v2880_v57 = vunpack.c.l.s4 %v3716_v32 }
 0x28a   : > { %3429 = vmatpush3.xpose.msra.mxu0 %v5477_v60 }
 0x28b   : > { %3467 = vmatpush3.xpose.msra.mxu1 %v5478_v29  ;;  %3430 = vmatprep.subr.mxu0 %v5479_v52 }
 0x28c   : > { %3468 = vmatprep.subr.mxu1 %v5480_v2 }
 0x28e   : > { %3431 = vmatpush3.xpose.msra.mxu0 %v5481_v56 }
 0x28f   : > { %3469 = vmatpush3.xpose.msra.mxu1 %v4852_v26  ;;  %3432 = vmatprep.subr.mxu0 %v5482_v5  ;;  %v948_v26 = vlaneseq }
 0x290   : > { %3470 = vmatprep.subr.mxu1 %v4860_v7 }
 0x292   : > { %3433 = vmatpush3.xpose.msra.mxu0 %v5483_v18 }
 0x293   : > { %3471 = vmatpush3.xpose.msra.mxu1 %v4883_v43  ;;  %3434 = vmatprep.subr.mxu0 %v5484_v34  ;;  %v1266_v43 = vpop.f32.mrf.mxu0  ;;  %v2881_v34 = vunpack.c.0.s8 %v2880_v57 }
 0x294   : > { %3472 = vmatprep.subr.mxu1 %v4888_v15  ;;  %v1500_v15 = vpop.f32.mrf.mxu1 }
 0x295   : > { %v1268_v41 = vpop.f32.mrf.mxu0 }
 0x296   : > { %3435 = vmatpush3.xpose.msra.mxu0 %v5485_v19  ;;  %v1741_v14 = vpop.f32.mrf.mxu1 }
 0x297   : > { %3473 = vmatpush3.xpose.msra.mxu1 %v4907_v0  ;;  %3436 = vmatprep.subr.mxu0 %v5486_v11  ;;  %v5490_v0 = vld [vmem:[#allocation22_spill] sm:$0xff]  ;;  %v1635_v7 = vpop.f32.mrf.mxu0 }
 0x298   : > { %3474 = vmatprep.subr.mxu1 %v4912_v36  ;;  %v5491_v58 = vand.u32 4294901760, %v5490_v0  ;;  %v949_v36 = vshrl.u32 %v948_v26, 7  ;;  %v1743_v50 = vpop.f32.mrf.mxu1 }
 0x29a   : > { %3437 = vmatpush3.xpose.msra.mxu0 %v5487_v31  ;;  %v954_v63 = vsub.s32 1, %v949_v36  ;;  %v950_v33 = vsub.s32 0, %v949_v36  ;;  %v962_v46 = vsub.s32 3, %v949_v36 }
 0x29b   : > { %3475 = vmatpush3.xpose.msra.mxu1 %v4929_v22  ;;  %3438 = vmatprep.subr.mxu0 %v5488_v25  ;;  %v1637_v22 = vpop.f32.mrf.mxu0 }
 0x29c   : > { %3476 = vmatprep.subr.mxu1 %v4935_v28 }
 0x29e   : > { %3439 = vmatpush3.xpose.msra.mxu0 %v5489_v16 }
 0x29f   : > { %3477 = vmatpush3.xpose.msra.mxu1 %v4947_v47  ;;  %3440 = vmatprep.subr.mxu0 %v5491_v58  ;;  %v958_v47 = vsub.s32 2, %v949_v36 }
 0x2a2   : > { %3479 = vmatmul.mubr.f32.vlgmr.msra.gmra.mxu1 %v4422_v53  ;;  %3441 = vmatpush3.xpose.msra.mxu0 %v5492_v35  ;;  %v2013_v42 = vpop.f32.mrf.mxu1  ;;  %v2884_v35 = vsub.s32 %v2881_v34, %v949_v36 }
 0x2a3   : > { %3442 = vmatprep.subr.mxu0 %v5493_v40 }
 0x2a4   : > { %v2015_v38 = vpop.f32.mrf.mxu1 }
 0x2a6   : > { %3443 = vmatpush3.xpose.msra.mxu0 %v5494_v51 }
 0x2a9   : > { %3445 = vmatmul.mubr.f32.vlgmr.msra.gmra.mxu0 %v4422_v53  ;;  %v1909_v61 = vpop.f32.mrf.mxu0  ;;  %v946_v53 = vld [vmem:[%s297_s16] sm:$0xf] }
 0x2aa   : > { %v955_v28 = vrot.slane %v946_v53, %v954_v63  ;;  %v951_v21 = vrot.slane %v946_v53, %v950_v33  ;;  %v959_v59 = vrot.slane %v946_v53, %v958_v47  ;;  %v963_v1 = vrot.slane %v946_v53, %v962_v46 }
 0x2ab   : > { %v1911_v45 = vpop.f32.mrf.mxu0 }
 0x2ac   : > { %v1269_v24 = vadd.f32 %v1268_v41, %v955_v28  ;;  %v1267_v37 = vadd.f32 %v1266_v43, %v951_v21 }
 0x2ae   : > { %v1501_v13 = vadd.f32 %v1500_v15, %v1269_v24  ;;  %v1499_v55 = vadd.f32 %v1498_v4, %v1267_v37 }
 0x2b0   : > { %v1638_v54 = vadd.f32 %v1637_v22, %v1501_v13  ;;  %v1636_v48 = vadd.f32 %v1635_v7, %v1499_v55 }
 0x2b2   : > { %v1744_v39 = vadd.f32 %v1743_v50, %v1638_v54  ;;  %v1742_v8 = vadd.f32 %v1741_v14, %v1636_v48 }
 0x2b4   : > { %v1912_v27 = vadd.f32 %v1911_v45, %v1744_v39  ;;  %v1910_v52 = vadd.f32 %v1909_v61, %v1742_v8 }
 0x2b6   : > { %v2016_v18 = vadd.f32 %v2015_v38, %v1912_v27  ;;  %v2014_v25 = vadd.f32 %v2013_v42, %v1910_v52 }
 0x2b8   : > { %v2877_v58 = vcombine.low %v2014_v25, %v2016_v18 }
 0x2ba   : > { %v2885_v4 = vrot.slane %v2877_v58, %v2884_v35 }
 0x2e2   : > { %v2353_v44 = vpop.f32.mrf.mxu1 }
 0x2e4   : > { %v2355_v62 = vpop.f32.mrf.mxu1 }
 0x2e9   : > { %v2121_v17 = vpop.f32.mrf.mxu0 }
 0x2ea   : > { %v2122_v6 = vadd.f32 %v2121_v17, %v959_v59 }
 0x2eb   : > { %v2123_v23 = vpop.f32.mrf.mxu0 }
 0x2ec   : > { %v2124_v9 = vadd.f32 %v2123_v23, %v963_v1  ;;  %v2354_v10 = vadd.f32 %v2353_v44, %v2122_v6 }
 0x2ee   : > { %v2356_v12 = vadd.f32 %v2355_v62, %v2124_v9 }
 0x322   : > { %v2596_v30 = vpop.f32.mrf.mxu1 }
 0x324   : > { %v2598_v29 = vpop.f32.mrf.mxu1 }
 0x329   : > { %v2490_v20 = vpop.f32.mrf.mxu0 }
 0x32a   : > { %v2491_v49 = vadd.f32 %v2490_v20, %v2354_v10 }
 0x32b   : > { %v2492_v3 = vpop.f32.mrf.mxu0 }
 0x32c   : > { %v2493_v60 = vadd.f32 %v2492_v3, %v2356_v12  ;;  %v2597_v2 = vadd.f32 %v2596_v30, %v2491_v49 }
 0x32e   : > { %v2599_v11 = vadd.f32 %v2598_v29, %v2493_v60 }
 0x362   : > { %v2868_v56 = vpop.f32.mrf.mxu1 }
 0x364   : > { %v2870_v0 = vpop.f32.mrf.mxu1 }
 0x369   : > { %v2764_v5 = vpop.f32.mrf.mxu0 }
 0x36a   : > { %v2765_v19 = vadd.f32 %v2764_v5, %v2597_v2 }
 0x36b   : > { %v2766_v31 = vpop.f32.mrf.mxu0 }
 0x36c   : > { %v2767_v16 = vadd.f32 %v2766_v31, %v2599_v11  ;;  %v2869_v40 = vadd.f32 %v2868_v56, %v2765_v19 }
 0x36e   : > { %v2871_v51 = vadd.f32 %v2870_v0, %v2767_v16 }
 0x370   : > { %v2878_v43 = vcombine.low %v2869_v40, %v2871_v51 }
 0x372   : > { %v2892_v41 = vrot.slane %v2878_v43, %v2884_v35 }
 0x374   : > { %v2893_v26 = vcombine.low %v2885_v4, %v2892_v41 }
 0x376   : > { %2895 = vst [vmem:[%s275_s20] sm:$0xff] %v2893_v26 }
 0x377   : > { %3662 = shalt.err (!%p3659_p13)
}
 0x378   : > { %s3663_s13 = scalar_lea.hbm %s2909_s24, 128  ;;  %s3667_s16 = scalar_lea.hbm %s5204_s6, 3968 }
 0x379   : > { %p3664_p0 = scmp.ne.s32.totalorder %s2909_s24, %s3663_s13  ;;  %p3668_p3 = scmp.lt.s32.totalorder %s2909_s24, %s5204_s6 }
 0x37a   : > { %p3669_p4 = scmp.lt.s32.totalorder %s3667_s16, %s3663_s13 }
 0x37b   : > { %p3665_p1 = pnand %p3664_p0, %p3794_p10 }
 0x37c   : > { %p3670_p5 = por %p3669_p4, %p3668_p3 }
 0x37d   : > { %p3666_p2 = pneg %p3665_p1 }
 0x37f   : > { %p3671_p6 = pnand %p3670_p5, %p3666_p2 }
 0x381   : > { %3674 = shalt.err (!%p3671_p6)
}
 0x382   : > { %3594 = dma.vmem_to_hbm [thread:$0]  (%p3794_p10), %s2912_s21, 128, %s2909_s24, %s2897_s25  }
 0x383 PF: > { %p3600_p7 = scmp.ge.s32.totalorder %s3711_s28, 2  ;;  %s2923_s19 = sand.u32 1, %s3699_s26  }
 0x384   : > { %s2924_s20 = scalar_lea.sflag [#allocation5], %s2923_s19 }
 0x385   : > { %p3597_p8 = pnand %p3600_p7, %p3798_p11 }
 0x387   : > { %p3598_p9 = pneg %p3597_p8 }
 0x389   : > { %3694 = dma.done.wait (%p3598_p9), %s2924_s20, 128  }
 0x38a   : > { %3696 = vsyncadd (%p3598_p9), %s2924_s20, 4294967168  ;;  %p22_p12 = scmp.ge.s32.totalorder %s3781_s7, 33   ;;  %s5495_s26 = smov %s3703_s27 }
 0x38b   : > { %s5496_s27 = smov %s3707_s0  ;;  %s5497_s0 = smov %s3792_s10 }
 0x38c   : > { %s5498_s28 = smov %s3781_s7  ;;  %24 = sbr.rel (!%p22_p12) target bundleno = 18 (0x12), region = 84 }
 0x391   :  { %2929 = vsyncpa [#allocation5], 1 }
 0x392   :  { %2931 = vsyncpa [#allocation5 + $0x1], 1 }

</bundles_post_ra>
